<compile_context>
chip_gen: v6e
topology: v6e:2x2x1
jax: 0.10.0
libtpu: 0.0.40
codegen_flags: <defaults>
</compile_context>

<pallas_src>
import functools

import numpy as np
import jax
import jax.numpy as jnp
from jax.experimental import pallas as pl
from jax.experimental.pallas import tpu as pltpu


MARGIN = 128  # lane margin on each side of each spatial slab (must be >= Wp + 1)


def _pick_group(n, cin, hid, cout, s, lm, budget_bytes=12 << 20):
    """Largest power-of-two image group that divides N and fits comfortably in VMEM."""
    for g in (8, 4, 2, 1):
        if n % g:
            continue
        scratch = 4 * g * (9 * cin * s + hid * lm + 9 * hid * s)
        io = 4 * g * (2 * cin * lm + 2 * cout * s)      # double-buffered in/out blocks
        if scratch + io <= budget_bytes:
            return g
    return 1


def _resblock_kernel(xs_ref, w1_ref, w2_ref, b1_ref, b2_ref, mask_ref,
                     o_ref, x9_ref, h1s_ref, h9_ref, *, wp):
    """One group of G images per grid step.

    xs_ref  : (1, G, Cin, LM)  zero-margined, spatially padded, flattened images
                               (LM = MARGIN + S + MARGIN, S = lane-padded Hp*Wp)
    w1_ref  : (Hid, 9*Cin)     conv1 weights, BN1 scale folded in, tap-major K
    w2_ref  : (Cout, 9*Hid)    conv2 weights, BN2 scale folded in
    b1_ref  : (Hid, 1)         fused conv1 + BN1 bias
    b2_ref  : (Cout, 1)        fused conv2 + BN2 bias
    mask_ref: (1, G*S)         1.0 at real output pixels, 0.0 at pad/garbage
    o_ref   : (1, G, Cout, S)  output slabs (same padded-frame raster as input)
    x9_ref  : (9*Cin, G*S)     scratch: stacked conv1 taps (matmul K axis)
    h1s_ref : (Hid, G*LM)      scratch: zero-margined conv1 activation slabs
    h9_ref  : (9*Hid, G*S)     scratch: stacked conv2 taps
    """
    g_imgs = xs_ref.shape[1]
    cin = xs_ref.shape[2]
    lm = xs_ref.shape[3]
    hid = w1_ref.shape[0]
    s = o_ref.shape[3]
    base = (lm - s) // 2                       # == MARGIN

    shifts = [dy * wp + dx for dy in (-1, 0, 1) for dx in (-1, 0, 1)]

    # ---- conv1: stack the 9 shifted taps (static lane slices), 1 MXU matmul ----
    for g in range(g_imgs):
        for t, sh in enumerate(shifts):
            off = base + sh
            x9_ref[t * cin:(t + 1) * cin, g * s:(g + 1) * s] = \
                xs_ref[0, g, :, off:off + s]
    h1 = jnp.dot(w1_ref[...], x9_ref[...], preferred_element_type=jnp.float32)
    # fused BN1 bias + ReLU; the mask re-creates the zero padding conv2 needs.
    h1 = jnp.maximum(h1 + b1_ref[...], 0.0) * mask_ref[...]            # (Hid, G*S)

    # ---- place h1 in margined slabs so conv2 taps are plain lane slices ----
    # (margins are 128-lane aligned stores; interiors are overwritten fully)
    zeros_margin = jnp.zeros((hid, base), jnp.float32)                 # hoisted const
    for g in range(g_imgs):
        h1s_ref[:, g * lm:g * lm + base] = zeros_margin
        h1s_ref[:, g * lm + base + s:(g + 1) * lm] = zeros_margin
        h1s_ref[:, g * lm + base:g * lm + base + s] = h1[:, g * s:(g + 1) * s]

    # ---- conv2: same stacking trick, 1 MXU matmul ----
    for g in range(g_imgs):
        for t, sh in enumerate(shifts):
            off = g * lm + base + sh
            h9_ref[t * hid:(t + 1) * hid, g * s:(g + 1) * s] = h1s_ref[:, off:off + s]
    h2 = jnp.dot(w2_ref[...], h9_ref[...], preferred_element_type=jnp.float32)
    h2 = jnp.maximum(h2 + b2_ref[...], 0.0)                            # (Cout, G*S)

    # ---- residual add (Cin == Cout) and lane-dense stores ----
    for g in range(g_imgs):
        o_ref[0, g] = (xs_ref[0, g, :, base:base + s]
                       + h2[:, g * s:(g + 1) * s]).astype(o_ref.dtype)


@jax.jit
def resblock_pallas(x, w1, b1, w2, b2, bn1, bn2, eps=1e-5):
    """x: (N, Cin, H, W) NCHW; w1/w2 in PyTorch OIHW layout; bn = (gamma, beta, mean, var)."""
    n, cin, h, w = x.shape
    hid = w1.shape[0]
    cout = w2.shape[0]
    assert cin == cout, "residual add requires in_size == out_size"
    hp, wp = h + 2, w + 2
    hw = hp * wp
    s = ((hw + 127) // 128) * 128          # lane-padded spatial extent
    assert MARGIN >= wp + 1, "image too wide for the fixed lane margin"
    lm = MARGIN + s + MARGIN

    g_imgs = _pick_group(n, cin, hid, cout, s, lm)
    nb = n // g_imgs

    # ---- fold eval-mode BatchNorm (+ conv bias) into the conv weights/bias ----
    g1, be1, m1, v1 = bn1
    g2, be2, m2, v2 = bn2
    s1 = g1 / jnp.sqrt(v1 + eps)
    s2 = g2 / jnp.sqrt(v2 + eps)
    w1_mat = (w1 * s1[:, None, None, None]).transpose(0, 2, 3, 1).reshape(hid, 9 * cin)
    w2_mat = (w2 * s2[:, None, None, None]).transpose(0, 2, 3, 1).reshape(cout, 9 * hid)
    b1_eff = (s1 * (b1 - m1) + be1).reshape(hid, 1)
    b2_eff = (s2 * (b2 - m2) + be2).reshape(cout, 1)

    # ---- lane-dense spatial slabs: [MARGIN zeros | padded Hp*Wp (+tail) | MARGIN zeros] ----
    x_flat = jnp.pad(x, ((0, 0), (0, 0), (1, 1), (1, 1))).reshape(n, cin, hw)
    xs = jnp.pad(x_flat, ((0, 0), (0, 0), (MARGIN, lm - MARGIN - hw)))
    xs = xs.reshape(nb, g_imgs, cin, lm)

    # interior mask over the padded-frame raster (trace-time numpy constant, tiled per image)
    rr = np.arange(hw) // wp
    cc = np.arange(hw) % wp
    interior = ((rr >= 1) & (rr <= h) & (cc >= 1) & (cc <= w)).astype(np.float32)
    mask1 = np.pad(interior, (0, s - hw))
    mask = jnp.asarray(np.tile(mask1, g_imgs).reshape(1, g_imgs * s))

    grid_spec = pltpu.PrefetchScalarGridSpec(
        num_scalar_prefetch=0,
        grid=(nb,),
        in_specs=[
            pl.BlockSpec((1, g_imgs, cin, lm), lambda i: (i, 0, 0, 0)),
            pl.BlockSpec((hid, 9 * cin), lambda i: (0, 0)),
            pl.BlockSpec((cout, 9 * hid), lambda i: (0, 0)),
            pl.BlockSpec((hid, 1), lambda i: (0, 0)),
            pl.BlockSpec((cout, 1), lambda i: (0, 0)),
            pl.BlockSpec((1, g_imgs * s), lambda i: (0, 0)),
        ],
        out_specs=pl.BlockSpec((1, g_imgs, cout, s), lambda i: (i, 0, 0, 0)),
        scratch_shapes=[
            pltpu.VMEM((9 * cin, g_imgs * s), jnp.float32),
            pltpu.VMEM((hid, g_imgs * lm), jnp.float32),
            pltpu.VMEM((9 * hid, g_imgs * s), jnp.float32),
        ],
    )

    out_slab = pl.pallas_call(
        functools.partial(_resblock_kernel, wp=wp),
        out_shape=jax.ShapeDtypeStruct((nb, g_imgs, cout, s), jnp.float32),
        grid_spec=grid_spec,
        compiler_params=pltpu.CompilerParams(
            dimension_semantics=("parallel",)),
    )(xs, w1_mat, w2_mat, b1_eff, b2_eff, mask)

    # drop pad / garbage positions:  (NB, G, Cout, S) -> (N, Cout, H, W)
    out = out_slab.reshape(n, cout, s)[:, :, :hw]
    return out.reshape(n, cout, hp, wp)[:, :, 1:h + 1, 1:w + 1]


def _ref_forward(x, w1, b1, w2, b2, bn1, bn2, eps=1e-5):
    """Pure-JAX NCHW reference (eval-mode BatchNorm), matches PyTorch semantics."""
    def conv(t, wgt, bias):
        y = jax.lax.conv_general_dilated(
            t, wgt, window_strides=(1, 1), padding=((1, 1), (1, 1)),
            dimension_numbers=("NCHW", "OIHW", "NCHW"))
        return y + bias[None, :, None, None]

    def bnorm(t, p):
        g, be, m, v = (a[None, :, None, None] for a in p)
        return g * (t - m) / jnp.sqrt(v + eps) + be

    hmid = jax.nn.relu(bnorm(conv(x, w1, b1), bn1))
    hout = jax.nn.relu(bnorm(conv(hmid, w2, b2), bn2))
    return x + hout


if __name__ == "__main__":
    # Small shapes consistent with the module: in_size == out_size for residual.
    N, CIN, HID, COUT, H, W = 2, 4, 8, 4, 16, 16

    key = jax.random.PRNGKey(0)
    keys = jax.random.split(key, 12)

    x = jax.random.normal(keys[0], (N, CIN, H, W), jnp.float32)

    # conv weights/bias in PyTorch OIHW layout.
    w1 = jax.random.normal(keys[1], (HID, CIN, 3, 3), jnp.float32) * 0.2
    b1 = jax.random.normal(keys[2], (HID,), jnp.float32) * 0.1
    w2 = jax.random.normal(keys[3], (COUT, HID, 3, 3), jnp.float32) * 0.2
    b2 = jax.random.normal(keys[4], (COUT,), jnp.float32) * 0.1

    # BatchNorm parameters / running stats (eval-mode semantics).
    g1 = 1.0 + 0.1 * jax.random.normal(keys[5], (HID,), jnp.float32)
    be1 = 0.1 * jax.random.normal(keys[6], (HID,), jnp.float32)
    m1 = 0.1 * jax.random.normal(keys[7], (HID,), jnp.float32)
    v1 = jnp.abs(1.0 + 0.1 * jax.random.normal(keys[8], (HID,), jnp.float32))
    g2 = 1.0 + 0.1 * jax.random.normal(keys[9], (COUT,), jnp.float32)
    be2 = 0.1 * jax.random.normal(keys[10], (COUT,), jnp.float32)
    m2 = 0.1 * jax.random.normal(keys[11], (COUT,), jnp.float32)
    v2 = jnp.ones((COUT,), jnp.float32)

    bn1 = (g1, be1, m1, v1)
    bn2 = (g2, be2, m2, v2)

    out = resblock_pallas(x, w1, b1, w2, b2, bn1, bn2)
    out = jax.block_until_ready(out)

    ref = _ref_forward(x, w1, b1, w2, b2, bn1, bn2)
    assert out.shape == (N, COUT, H, W)
    err = jnp.max(jnp.abs(out - ref))
    assert jnp.allclose(out, ref, atol=1e-3, rtol=1e-3), f"mismatch, max err {err}"

    print("KERNEL_OK")
</pallas_src>

<mosaic_0001>
module attributes {stable_mosaic.version = 11 : i64} {
  func.func @_resblock_kernel(%arg0: i32, %arg1: memref<1x2x4x640xf32, #tpu.memory_space<vmem>>, %arg2: memref<8x36xf32, #tpu.memory_space<vmem>>, %arg3: memref<4x72xf32, #tpu.memory_space<vmem>>, %arg4: memref<8x1xf32, #tpu.memory_space<vmem>>, %arg5: memref<4x1xf32, #tpu.memory_space<vmem>>, %arg6: memref<1x768xf32, #tpu.memory_space<vmem>>, %arg7: memref<1x2x4x384xf32, #tpu.memory_space<vmem>>, %arg8: memref<36x768xf32, #tpu.memory_space<vmem>>, %arg9: memref<8x1280xf32, #tpu.memory_space<vmem>>, %arg10: memref<72x768xf32, #tpu.memory_space<vmem>>) attributes {dimension_semantics = [#tpu.dimension_semantics<parallel>], iteration_bounds = array<i64: 1>, scalar_prefetch = 0 : i64, scratch_operands = 3 : i64, tpu.core_type = #tpu.core_type<tc>, window_params = [{transform_indices = @transform_0, window_bounds = array<i64: 1, 2, 4, 640>}, {pipeline_mode = #tpu.pipeline_mode<synchronous>, transform_indices = @transform_1, window_bounds = array<i64: 8, 36>}, {pipeline_mode = #tpu.pipeline_mode<synchronous>, transform_indices = @transform_2, window_bounds = array<i64: 4, 72>}, {pipeline_mode = #tpu.pipeline_mode<synchronous>, transform_indices = @transform_3, window_bounds = array<i64: 8, 1>}, {pipeline_mode = #tpu.pipeline_mode<synchronous>, transform_indices = @transform_4, window_bounds = array<i64: 4, 1>}, {pipeline_mode = #tpu.pipeline_mode<synchronous>, transform_indices = @transform_5, window_bounds = array<i64: 1, 768>}, {transform_indices = @transform_6, window_bounds = array<i64: 1, 2, 4, 384>}]} {
    %c0 = arith.constant 0 : index
    %c0_0 = arith.constant 0 : index
    %c0_1 = arith.constant 0 : index
    %c109 = arith.constant 109 : index
    %0 = vector.load %arg1[%c0, %c0_0, %c0_1, %c109] : memref<1x2x4x640xf32, #tpu.memory_space<vmem>>, vector<1x1x4x384xf32>
    %1 = vector.shape_cast %0 : vector<1x1x4x384xf32> to vector<4x384xf32>
    %c0_2 = arith.constant 0 : index
    %c0_3 = arith.constant 0 : index
    %2 = vector.load %arg8[%c0_2, %c0_3] : memref<36x768xf32, #tpu.memory_space<vmem>>, vector<4x384xf32>
    tpu.vector_store %arg8[%c0_2, %c0_3], %1 {strides = array<i32>} : memref<36x768xf32, #tpu.memory_space<vmem>>, vector<4x384xf32>,
    %c0_4 = arith.constant 0 : index
    %c0_5 = arith.constant 0 : index
    %c0_6 = arith.constant 0 : index
    %c110 = arith.constant 110 : index
    %3 = vector.load %arg1[%c0_4, %c0_5, %c0_6, %c110] : memref<1x2x4x640xf32, #tpu.memory_space<vmem>>, vector<1x1x4x384xf32>
    %4 = vector.shape_cast %3 : vector<1x1x4x384xf32> to vector<4x384xf32>
    %c4 = arith.constant 4 : index
    %c0_7 = arith.constant 0 : index
    %5 = vector.load %arg8[%c4, %c0_7] : memref<36x768xf32, #tpu.memory_space<vmem>>, vector<4x384xf32>
    tpu.vector_store %arg8[%c4, %c0_7], %4 {strides = array<i32>} : memref<36x768xf32, #tpu.memory_space<vmem>>, vector<4x384xf32>,
    %c0_8 = arith.constant 0 : index
    %c0_9 = arith.constant 0 : index
    %c0_10 = arith.constant 0 : index
    %c111 = arith.constant 111 : index
    %6 = vector.load %arg1[%c0_8, %c0_9, %c0_10, %c111] : memref<1x2x4x640xf32, #tpu.memory_space<vmem>>, vector<1x1x4x384xf32>
    %7 = vector.shape_cast %6 : vector<1x1x4x384xf32> to vector<4x384xf32>
    %c8 = arith.constant 8 : index
    %c0_11 = arith.constant 0 : index
    %8 = vector.load %arg8[%c8, %c0_11] : memref<36x768xf32, #tpu.memory_space<vmem>>, vector<4x384xf32>
    tpu.vector_store %arg8[%c8, %c0_11], %7 {strides = array<i32>} : memref<36x768xf32, #tpu.memory_space<vmem>>, vector<4x384xf32>,
    %c0_12 = arith.constant 0 : index
    %c0_13 = arith.constant 0 : index
    %c0_14 = arith.constant 0 : index
    %c127 = arith.constant 127 : index
    %9 = vector.load %arg1[%c0_12, %c0_13, %c0_14, %c127] : memref<1x2x4x640xf32, #tpu.memory_space<vmem>>, vector<1x1x4x384xf32>
    %10 = vector.shape_cast %9 : vector<1x1x4x384xf32> to vector<4x384xf32>
    %c12 = arith.constant 12 : index
    %c0_15 = arith.constant 0 : index
    %11 = vector.load %arg8[%c12, %c0_15] : memref<36x768xf32, #tpu.memory_space<vmem>>, vector<4x384xf32>
    tpu.vector_store %arg8[%c12, %c0_15], %10 {strides = array<i32>} : memref<36x768xf32, #tpu.memory_space<vmem>>, vector<4x384xf32>,
    %c0_16 = arith.constant 0 : index
    %c0_17 = arith.constant 0 : index
    %c0_18 = arith.constant 0 : index
    %c128 = arith.constant 128 : index
    %12 = vector.load %arg1[%c0_16, %c0_17, %c0_18, %c128] : memref<1x2x4x640xf32, #tpu.memory_space<vmem>>, vector<1x1x4x384xf32>
    %13 = vector.shape_cast %12 : vector<1x1x4x384xf32> to vector<4x384xf32>
    %c16 = arith.constant 16 : index
    %c0_19 = arith.constant 0 : index
    %14 = vector.load %arg8[%c16, %c0_19] : memref<36x768xf32, #tpu.memory_space<vmem>>, vector<4x384xf32>
    tpu.vector_store %arg8[%c16, %c0_19], %13 {strides = array<i32>} : memref<36x768xf32, #tpu.memory_space<vmem>>, vector<4x384xf32>,
    %c0_20 = arith.constant 0 : index
    %c0_21 = arith.constant 0 : index
    %c0_22 = arith.constant 0 : index
    %c129 = arith.constant 129 : index
    %15 = vector.load %arg1[%c0_20, %c0_21, %c0_22, %c129] : memref<1x2x4x640xf32, #tpu.memory_space<vmem>>, vector<1x1x4x384xf32>
    %16 = vector.shape_cast %15 : vector<1x1x4x384xf32> to vector<4x384xf32>
    %c20 = arith.constant 20 : index
    %c0_23 = arith.constant 0 : index
    %17 = vector.load %arg8[%c20, %c0_23] : memref<36x768xf32, #tpu.memory_space<vmem>>, vector<4x384xf32>
    tpu.vector_store %arg8[%c20, %c0_23], %16 {strides = array<i32>} : memref<36x768xf32, #tpu.memory_space<vmem>>, vector<4x384xf32>,
    %c0_24 = arith.constant 0 : index
    %c0_25 = arith.constant 0 : index
    %c0_26 = arith.constant 0 : index
    %c145 = arith.constant 145 : index
    %18 = vector.load %arg1[%c0_24, %c0_25, %c0_26, %c145] : memref<1x2x4x640xf32, #tpu.memory_space<vmem>>, vector<1x1x4x384xf32>
    %19 = vector.shape_cast %18 : vector<1x1x4x384xf32> to vector<4x384xf32>
    %c24 = arith.constant 24 : index
    %c0_27 = arith.constant 0 : index
    %20 = vector.load %arg8[%c24, %c0_27] : memref<36x768xf32, #tpu.memory_space<vmem>>, vector<4x384xf32>
    tpu.vector_store %arg8[%c24, %c0_27], %19 {strides = array<i32>} : memref<36x768xf32, #tpu.memory_space<vmem>>, vector<4x384xf32>,
    %c0_28 = arith.constant 0 : index
    %c0_29 = arith.constant 0 : index
    %c0_30 = arith.constant 0 : index
    %c146 = arith.constant 146 : index
    %21 = vector.load %arg1[%c0_28, %c0_29, %c0_30, %c146] : memref<1x2x4x640xf32, #tpu.memory_space<vmem>>, vector<1x1x4x384xf32>
    %22 = vector.shape_cast %21 : vector<1x1x4x384xf32> to vector<4x384xf32>
    %c28 = arith.constant 28 : index
    %c0_31 = arith.constant 0 : index
    %23 = vector.load %arg8[%c28, %c0_31] : memref<36x768xf32, #tpu.memory_space<vmem>>, vector<4x384xf32>
    tpu.vector_store %arg8[%c28, %c0_31], %22 {strides = array<i32>} : memref<36x768xf32, #tpu.memory_space<vmem>>, vector<4x384xf32>,
    %c0_32 = arith.constant 0 : index
    %c0_33 = arith.constant 0 : index
    %c0_34 = arith.constant 0 : index
    %c147 = arith.constant 147 : index
    %24 = vector.load %arg1[%c0_32, %c0_33, %c0_34, %c147] : memref<1x2x4x640xf32, #tpu.memory_space<vmem>>, vector<1x1x4x384xf32>
    %25 = vector.shape_cast %24 : vector<1x1x4x384xf32> to vector<4x384xf32>
    %c32 = arith.constant 32 : index
    %c0_35 = arith.constant 0 : index
    %26 = vector.load %arg8[%c32, %c0_35] : memref<36x768xf32, #tpu.memory_space<vmem>>, vector<4x384xf32>
    tpu.vector_store %arg8[%c32, %c0_35], %25 {strides = array<i32>} : memref<36x768xf32, #tpu.memory_space<vmem>>, vector<4x384xf32>,
    %c0_36 = arith.constant 0 : index
    %c1 = arith.constant 1 : index
    %c0_37 = arith.constant 0 : index
    %c109_38 = arith.constant 109 : index
    %27 = vector.load %arg1[%c0_36, %c1, %c0_37, %c109_38] : memref<1x2x4x640xf32, #tpu.memory_space<vmem>>, vector<1x1x4x384xf32>
    %28 = vector.shape_cast %27 : vector<1x1x4x384xf32> to vector<4x384xf32>
    %c0_39 = arith.constant 0 : index
    %c384 = arith.constant 384 : index
    %29 = vector.load %arg8[%c0_39, %c384] : memref<36x768xf32, #tpu.memory_space<vmem>>, vector<4x384xf32>
    tpu.vector_store %arg8[%c0_39, %c384], %28 {strides = array<i32>} : memref<36x768xf32, #tpu.memory_space<vmem>>, vector<4x384xf32>,
    %c0_40 = arith.constant 0 : index
    %c1_41 = arith.constant 1 : index
    %c0_42 = arith.constant 0 : index
    %c110_43 = arith.constant 110 : index
    %30 = vector.load %arg1[%c0_40, %c1_41, %c0_42, %c110_43] : memref<1x2x4x640xf32, #tpu.memory_space<vmem>>, vector<1x1x4x384xf32>
    %31 = vector.shape_cast %30 : vector<1x1x4x384xf32> to vector<4x384xf32>
    %c4_44 = arith.constant 4 : index
    %c384_45 = arith.constant 384 : index
    %32 = vector.load %arg8[%c4_44, %c384_45] : memref<36x768xf32, #tpu.memory_space<vmem>>, vector<4x384xf32>
    tpu.vector_store %arg8[%c4_44, %c384_45], %31 {strides = array<i32>} : memref<36x768xf32, #tpu.memory_space<vmem>>, vector<4x384xf32>,
    %c0_46 = arith.constant 0 : index
    %c1_47 = arith.constant 1 : index
    %c0_48 = arith.constant 0 : index
    %c111_49 = arith.constant 111 : index
    %33 = vector.load %arg1[%c0_46, %c1_47, %c0_48, %c111_49] : memref<1x2x4x640xf32, #tpu.memory_space<vmem>>, vector<1x1x4x384xf32>
    %34 = vector.shape_cast %33 : vector<1x1x4x384xf32> to vector<4x384xf32>
    %c8_50 = arith.constant 8 : index
    %c384_51 = arith.constant 384 : index
    %35 = vector.load %arg8[%c8_50, %c384_51] : memref<36x768xf32, #tpu.memory_space<vmem>>, vector<4x384xf32>
    tpu.vector_store %arg8[%c8_50, %c384_51], %34 {strides = array<i32>} : memref<36x768xf32, #tpu.memory_space<vmem>>, vector<4x384xf32>,
    %c0_52 = arith.constant 0 : index
    %c1_53 = arith.constant 1 : index
    %c0_54 = arith.constant 0 : index
    %c127_55 = arith.constant 127 : index
    %36 = vector.load %arg1[%c0_52, %c1_53, %c0_54, %c127_55] : memref<1x2x4x640xf32, #tpu.memory_space<vmem>>, vector<1x1x4x384xf32>
    %37 = vector.shape_cast %36 : vector<1x1x4x384xf32> to vector<4x384xf32>
    %c12_56 = arith.constant 12 : index
    %c384_57 = arith.constant 384 : index
    %38 = vector.load %arg8[%c12_56, %c384_57] : memref<36x768xf32, #tpu.memory_space<vmem>>, vector<4x384xf32>
    tpu.vector_store %arg8[%c12_56, %c384_57], %37 {strides = array<i32>} : memref<36x768xf32, #tpu.memory_space<vmem>>, vector<4x384xf32>,
    %c0_58 = arith.constant 0 : index
    %c1_59 = arith.constant 1 : index
    %c0_60 = arith.constant 0 : index
    %c128_61 = arith.constant 128 : index
    %39 = vector.load %arg1[%c0_58, %c1_59, %c0_60, %c128_61] : memref<1x2x4x640xf32, #tpu.memory_space<vmem>>, vector<1x1x4x384xf32>
    %40 = vector.shape_cast %39 : vector<1x1x4x384xf32> to vector<4x384xf32>
    %c16_62 = arith.constant 16 : index
    %c384_63 = arith.constant 384 : index
    %41 = vector.load %arg8[%c16_62, %c384_63] : memref<36x768xf32, #tpu.memory_space<vmem>>, vector<4x384xf32>
    tpu.vector_store %arg8[%c16_62, %c384_63], %40 {strides = array<i32>} : memref<36x768xf32, #tpu.memory_space<vmem>>, vector<4x384xf32>,
    %c0_64 = arith.constant 0 : index
    %c1_65 = arith.constant 1 : index
    %c0_66 = arith.constant 0 : index
    %c129_67 = arith.constant 129 : index
    %42 = vector.load %arg1[%c0_64, %c1_65, %c0_66, %c129_67] : memref<1x2x4x640xf32, #tpu.memory_space<vmem>>, vector<1x1x4x384xf32>
    %43 = vector.shape_cast %42 : vector<1x1x4x384xf32> to vector<4x384xf32>
    %c20_68 = arith.constant 20 : index
    %c384_69 = arith.constant 384 : index
    %44 = vector.load %arg8[%c20_68, %c384_69] : memref<36x768xf32, #tpu.memory_space<vmem>>, vector<4x384xf32>
    tpu.vector_store %arg8[%c20_68, %c384_69], %43 {strides = array<i32>} : memref<36x768xf32, #tpu.memory_space<vmem>>, vector<4x384xf32>,
    %c0_70 = arith.constant 0 : index
    %c1_71 = arith.constant 1 : index
    %c0_72 = arith.constant 0 : index
    %c145_73 = arith.constant 145 : index
    %45 = vector.load %arg1[%c0_70, %c1_71, %c0_72, %c145_73] : memref<1x2x4x640xf32, #tpu.memory_space<vmem>>, vector<1x1x4x384xf32>
    %46 = vector.shape_cast %45 : vector<1x1x4x384xf32> to vector<4x384xf32>
    %c24_74 = arith.constant 24 : index
    %c384_75 = arith.constant 384 : index
    %47 = vector.load %arg8[%c24_74, %c384_75] : memref<36x768xf32, #tpu.memory_space<vmem>>, vector<4x384xf32>
    tpu.vector_store %arg8[%c24_74, %c384_75], %46 {strides = array<i32>} : memref<36x768xf32, #tpu.memory_space<vmem>>, vector<4x384xf32>,
    %c0_76 = arith.constant 0 : index
    %c1_77 = arith.constant 1 : index
    %c0_78 = arith.constant 0 : index
    %c146_79 = arith.constant 146 : index
    %48 = vector.load %arg1[%c0_76, %c1_77, %c0_78, %c146_79] : memref<1x2x4x640xf32, #tpu.memory_space<vmem>>, vector<1x1x4x384xf32>
    %49 = vector.shape_cast %48 : vector<1x1x4x384xf32> to vector<4x384xf32>
    %c28_80 = arith.constant 28 : index
    %c384_81 = arith.constant 384 : index
    %50 = vector.load %arg8[%c28_80, %c384_81] : memref<36x768xf32, #tpu.memory_space<vmem>>, vector<4x384xf32>
    tpu.vector_store %arg8[%c28_80, %c384_81], %49 {strides = array<i32>} : memref<36x768xf32, #tpu.memory_space<vmem>>, vector<4x384xf32>,
    %c0_82 = arith.constant 0 : index
    %c1_83 = arith.constant 1 : index
    %c0_84 = arith.constant 0 : index
    %c147_85 = arith.constant 147 : index
    %51 = vector.load %arg1[%c0_82, %c1_83, %c0_84, %c147_85] : memref<1x2x4x640xf32, #tpu.memory_space<vmem>>, vector<1x1x4x384xf32>
    %52 = vector.shape_cast %51 : vector<1x1x4x384xf32> to vector<4x384xf32>
    %c32_86 = arith.constant 32 : index
    %c384_87 = arith.constant 384 : index
    %53 = vector.load %arg8[%c32_86, %c384_87] : memref<36x768xf32, #tpu.memory_space<vmem>>, vector<4x384xf32>
    tpu.vector_store %arg8[%c32_86, %c384_87], %52 {strides = array<i32>} : memref<36x768xf32, #tpu.memory_space<vmem>>, vector<4x384xf32>,
    %c0_88 = arith.constant 0 : index
    %c0_89 = arith.constant 0 : index
    %54 = vector.load %arg2[%c0_88, %c0_89] : memref<8x36xf32, #tpu.memory_space<vmem>>, vector<8x36xf32>
    %c0_90 = arith.constant 0 : index
    %c0_91 = arith.constant 0 : index
    %55 = vector.load %arg8[%c0_90, %c0_91] : memref<36x768xf32, #tpu.memory_space<vmem>>, vector<36x768xf32>
    %cst = arith.constant dense<0.000000e+00> : vector<8x768xf32>
    %56 = tpu.matmul %54, %55, %cst {dimension_numbers = #tpu.dot_dimension_numbers<[1], [0], [0], [1], [0, 0, 1, 1], [], []>} : vector<8x36xf32>, vector<36x768xf32>, vector<8x768xf32> -> vector<8x768xf32>
    %c0_92 = arith.constant 0 : index
    %c0_93 = arith.constant 0 : index
    %57 = vector.load %arg4[%c0_92, %c0_93] : memref<8x1xf32, #tpu.memory_space<vmem>>, vector<8x1xf32>
    %58 = vector.broadcast %57 : vector<8x1xf32> to vector<8x768xf32>
    %59 = arith.addf %56, %58 : vector<8x768xf32>
    %cst_94 = arith.constant 0.000000e+00 : f32
    %60 = vector.broadcast %cst_94 : f32 to vector<8x768xf32>
    %61 = arith.maximumf %59, %60 : vector<8x768xf32>
    %c0_95 = arith.constant 0 : index
    %c0_96 = arith.constant 0 : index
    %62 = vector.load %arg6[%c0_95, %c0_96] : memref<1x768xf32, #tpu.memory_space<vmem>>, vector<1x768xf32>
    %63 = vector.broadcast %62 : vector<1x768xf32> to vector<8x768xf32>
    %64 = arith.mulf %61, %63 : vector<8x768xf32>
    %cst_97 = arith.constant 0.000000e+00 : f32
    %65 = vector.broadcast %cst_97 : f32 to vector<8x128xf32>
    %c0_98 = arith.constant 0 : index
    %c0_99 = arith.constant 0 : index
    %66 = vector.load %arg9[%c0_98, %c0_99] : memref<8x1280xf32, #tpu.memory_space<vmem>>, vector<8x128xf32>
    tpu.vector_store %arg9[%c0_98, %c0_99], %65 {strides = array<i32>} : memref<8x1280xf32, #tpu.memory_space<vmem>>, vector<8x128xf32>,
    %c0_100 = arith.constant 0 : index
    %c512 = arith.constant 512 : index
    %67 = vector.load %arg9[%c0_100, %c512] : memref<8x1280xf32, #tpu.memory_space<vmem>>, vector<8x128xf32>
    tpu.vector_store %arg9[%c0_100, %c512], %65 {strides = array<i32>} : memref<8x1280xf32, #tpu.memory_space<vmem>>, vector<8x128xf32>,
    %68 = vector.extract_strided_slice %64 {offsets = [0, 0], sizes = [8, 384], strides = [1, 1]} : vector<8x768xf32> to vector<8x384xf32>
    %c0_101 = arith.constant 0 : index
    %c128_102 = arith.constant 128 : index
    %69 = vector.load %arg9[%c0_101, %c128_102] : memref<8x1280xf32, #tpu.memory_space<vmem>>, vector<8x384xf32>
    tpu.vector_store %arg9[%c0_101, %c128_102], %68 {strides = array<i32>} : memref<8x1280xf32, #tpu.memory_space<vmem>>, vector<8x384xf32>,
    %c0_103 = arith.constant 0 : index
    %c640 = arith.constant 640 : index
    %70 = vector.load %arg9[%c0_103, %c640] : memref<8x1280xf32, #tpu.memory_space<vmem>>, vector<8x128xf32>
    tpu.vector_store %arg9[%c0_103, %c640], %65 {strides = array<i32>} : memref<8x1280xf32, #tpu.memory_space<vmem>>, vector<8x128xf32>,
    %c0_104 = arith.constant 0 : index
    %c1152 = arith.constant 1152 : index
    %71 = vector.load %arg9[%c0_104, %c1152] : memref<8x1280xf32, #tpu.memory_space<vmem>>, vector<8x128xf32>
    tpu.vector_store %arg9[%c0_104, %c1152], %65 {strides = array<i32>} : memref<8x1280xf32, #tpu.memory_space<vmem>>, vector<8x128xf32>,
    %72 = vector.extract_strided_slice %64 {offsets = [0, 384], sizes = [8, 384], strides = [1, 1]} : vector<8x768xf32> to vector<8x384xf32>
    %c0_105 = arith.constant 0 : index
    %c768 = arith.constant 768 : index
    %73 = vector.load %arg9[%c0_105, %c768] : memref<8x1280xf32, #tpu.memory_space<vmem>>, vector<8x384xf32>
    tpu.vector_store %arg9[%c0_105, %c768], %72 {strides = array<i32>} : memref<8x1280xf32, #tpu.memory_space<vmem>>, vector<8x384xf32>,
    %c0_106 = arith.constant 0 : index
    %c109_107 = arith.constant 109 : index
    %74 = vector.load %arg9[%c0_106, %c109_107] : memref<8x1280xf32, #tpu.memory_space<vmem>>, vector<8x384xf32>
    %c0_108 = arith.constant 0 : index
    %c0_109 = arith.constant 0 : index
    %75 = vector.load %arg10[%c0_108, %c0_109] : memref<72x768xf32, #tpu.memory_space<vmem>>, vector<8x384xf32>
    tpu.vector_store %arg10[%c0_108, %c0_109], %74 {strides = array<i32>} : memref<72x768xf32, #tpu.memory_space<vmem>>, vector<8x384xf32>,
    %c0_110 = arith.constant 0 : index
    %c110_111 = arith.constant 110 : index
    %76 = vector.load %arg9[%c0_110, %c110_111] : memref<8x1280xf32, #tpu.memory_space<vmem>>, vector<8x384xf32>
    %c8_112 = arith.constant 8 : index
    %c0_113 = arith.constant 0 : index
    %77 = vector.load %arg10[%c8_112, %c0_113] : memref<72x768xf32, #tpu.memory_space<vmem>>, vector<8x384xf32>
    tpu.vector_store %arg10[%c8_112, %c0_113], %76 {strides = array<i32>} : memref<72x768xf32, #tpu.memory_space<vmem>>, vector<8x384xf32>,
    %c0_114 = arith.constant 0 : index
    %c111_115 = arith.constant 111 : index
    %78 = vector.load %arg9[%c0_114, %c111_115] : memref<8x1280xf32, #tpu.memory_space<vmem>>, vector<8x384xf32>
    %c16_116 = arith.constant 16 : index
    %c0_117 = arith.constant 0 : index
    %79 = vector.load %arg10[%c16_116, %c0_117] : memref<72x768xf32, #tpu.memory_space<vmem>>, vector<8x384xf32>
    tpu.vector_store %arg10[%c16_116, %c0_117], %78 {strides = array<i32>} : memref<72x768xf32, #tpu.memory_space<vmem>>, vector<8x384xf32>,
    %c0_118 = arith.constant 0 : index
    %c127_119 = arith.constant 127 : index
    %80 = vector.load %arg9[%c0_118, %c127_119] : memref<8x1280xf32, #tpu.memory_space<vmem>>, vector<8x384xf32>
    %c24_120 = arith.constant 24 : index
    %c0_121 = arith.constant 0 : index
    %81 = vector.load %arg10[%c24_120, %c0_121] : memref<72x768xf32, #tpu.memory_space<vmem>>, vector<8x384xf32>
    tpu.vector_store %arg10[%c24_120, %c0_121], %80 {strides = array<i32>} : memref<72x768xf32, #tpu.memory_space<vmem>>, vector<8x384xf32>,
    %c0_122 = arith.constant 0 : index
    %c128_123 = arith.constant 128 : index
    %82 = vector.load %arg9[%c0_122, %c128_123] : memref<8x1280xf32, #tpu.memory_space<vmem>>, vector<8x384xf32>
    %c32_124 = arith.constant 32 : index
    %c0_125 = arith.constant 0 : index
    %83 = vector.load %arg10[%c32_124, %c0_125] : memref<72x768xf32, #tpu.memory_space<vmem>>, vector<8x384xf32>
    tpu.vector_store %arg10[%c32_124, %c0_125], %82 {strides = array<i32>} : memref<72x768xf32, #tpu.memory_space<vmem>>, vector<8x384xf32>,
    %c0_126 = arith.constant 0 : index
    %c129_127 = arith.constant 129 : index
    %84 = vector.load %arg9[%c0_126, %c129_127] : memref<8x1280xf32, #tpu.memory_space<vmem>>, vector<8x384xf32>
    %c40 = arith.constant 40 : index
    %c0_128 = arith.constant 0 : index
    %85 = vector.load %arg10[%c40, %c0_128] : memref<72x768xf32, #tpu.memory_space<vmem>>, vector<8x384xf32>
    tpu.vector_store %arg10[%c40, %c0_128], %84 {strides = array<i32>} : memref<72x768xf32, #tpu.memory_space<vmem>>, vector<8x384xf32>,
    %c0_129 = arith.constant 0 : index
    %c145_130 = arith.constant 145 : index
    %86 = vector.load %arg9[%c0_129, %c145_130] : memref<8x1280xf32, #tpu.memory_space<vmem>>, vector<8x384xf32>
    %c48 = arith.constant 48 : index
    %c0_131 = arith.constant 0 : index
    %87 = vector.load %arg10[%c48, %c0_131] : memref<72x768xf32, #tpu.memory_space<vmem>>, vector<8x384xf32>
    tpu.vector_store %arg10[%c48, %c0_131], %86 {strides = array<i32>} : memref<72x768xf32, #tpu.memory_space<vmem>>, vector<8x384xf32>,
    %c0_132 = arith.constant 0 : index
    %c146_133 = arith.constant 146 : index
    %88 = vector.load %arg9[%c0_132, %c146_133] : memref<8x1280xf32, #tpu.memory_space<vmem>>, vector<8x384xf32>
    %c56 = arith.constant 56 : index
    %c0_134 = arith.constant 0 : index
    %89 = vector.load %arg10[%c56, %c0_134] : memref<72x768xf32, #tpu.memory_space<vmem>>, vector<8x384xf32>
    tpu.vector_store %arg10[%c56, %c0_134], %88 {strides = array<i32>} : memref<72x768xf32, #tpu.memory_space<vmem>>, vector<8x384xf32>,
    %c0_135 = arith.constant 0 : index
    %c147_136 = arith.constant 147 : index
    %90 = vector.load %arg9[%c0_135, %c147_136] : memref<8x1280xf32, #tpu.memory_space<vmem>>, vector<8x384xf32>
    %c64 = arith.constant 64 : index
    %c0_137 = arith.constant 0 : index
    %91 = vector.load %arg10[%c64, %c0_137] : memref<72x768xf32, #tpu.memory_space<vmem>>, vector<8x384xf32>
    tpu.vector_store %arg10[%c64, %c0_137], %90 {strides = array<i32>} : memref<72x768xf32, #tpu.memory_space<vmem>>, vector<8x384xf32>,
    %c0_138 = arith.constant 0 : index
    %c749 = arith.constant 749 : index
    %92 = vector.load %arg9[%c0_138, %c749] : memref<8x1280xf32, #tpu.memory_space<vmem>>, vector<8x384xf32>
    %c0_139 = arith.constant 0 : index
    %c384_140 = arith.constant 384 : index
    %93 = vector.load %arg10[%c0_139, %c384_140] : memref<72x768xf32, #tpu.memory_space<vmem>>, vector<8x384xf32>
    tpu.vector_store %arg10[%c0_139, %c384_140], %92 {strides = array<i32>} : memref<72x768xf32, #tpu.memory_space<vmem>>, vector<8x384xf32>,
    %c0_141 = arith.constant 0 : index
    %c750 = arith.constant 750 : index
    %94 = vector.load %arg9[%c0_141, %c750] : memref<8x1280xf32, #tpu.memory_space<vmem>>, vector<8x384xf32>
    %c8_142 = arith.constant 8 : index
    %c384_143 = arith.constant 384 : index
    %95 = vector.load %arg10[%c8_142, %c384_143] : memref<72x768xf32, #tpu.memory_space<vmem>>, vector<8x384xf32>
    tpu.vector_store %arg10[%c8_142, %c384_143], %94 {strides = array<i32>} : memref<72x768xf32, #tpu.memory_space<vmem>>, vector<8x384xf32>,
    %c0_144 = arith.constant 0 : index
    %c751 = arith.constant 751 : index
    %96 = vector.load %arg9[%c0_144, %c751] : memref<8x1280xf32, #tpu.memory_space<vmem>>, vector<8x384xf32>
    %c16_145 = arith.constant 16 : index
    %c384_146 = arith.constant 384 : index
    %97 = vector.load %arg10[%c16_145, %c384_146] : memref<72x768xf32, #tpu.memory_space<vmem>>, vector<8x384xf32>
    tpu.vector_store %arg10[%c16_145, %c384_146], %96 {strides = array<i32>} : memref<72x768xf32, #tpu.memory_space<vmem>>, vector<8x384xf32>,
    %c0_147 = arith.constant 0 : index
    %c767 = arith.constant 767 : index
    %98 = vector.load %arg9[%c0_147, %c767] : memref<8x1280xf32, #tpu.memory_space<vmem>>, vector<8x384xf32>
    %c24_148 = arith.constant 24 : index
    %c384_149 = arith.constant 384 : index
    %99 = vector.load %arg10[%c24_148, %c384_149] : memref<72x768xf32, #tpu.memory_space<vmem>>, vector<8x384xf32>
    tpu.vector_store %arg10[%c24_148, %c384_149], %98 {strides = array<i32>} : memref<72x768xf32, #tpu.memory_space<vmem>>, vector<8x384xf32>,
    %c0_150 = arith.constant 0 : index
    %c768_151 = arith.constant 768 : index
    %100 = vector.load %arg9[%c0_150, %c768_151] : memref<8x1280xf32, #tpu.memory_space<vmem>>, vector<8x384xf32>
    %c32_152 = arith.constant 32 : index
    %c384_153 = arith.constant 384 : index
    %101 = vector.load %arg10[%c32_152, %c384_153] : memref<72x768xf32, #tpu.memory_space<vmem>>, vector<8x384xf32>
    tpu.vector_store %arg10[%c32_152, %c384_153], %100 {strides = array<i32>} : memref<72x768xf32, #tpu.memory_space<vmem>>, vector<8x384xf32>,
    %c0_154 = arith.constant 0 : index
    %c769 = arith.constant 769 : index
    %102 = vector.load %arg9[%c0_154, %c769] : memref<8x1280xf32, #tpu.memory_space<vmem>>, vector<8x384xf32>
    %c40_155 = arith.constant 40 : index
    %c384_156 = arith.constant 384 : index
    %103 = vector.load %arg10[%c40_155, %c384_156] : memref<72x768xf32, #tpu.memory_space<vmem>>, vector<8x384xf32>
    tpu.vector_store %arg10[%c40_155, %c384_156], %102 {strides = array<i32>} : memref<72x768xf32, #tpu.memory_space<vmem>>, vector<8x384xf32>,
    %c0_157 = arith.constant 0 : index
    %c785 = arith.constant 785 : index
    %104 = vector.load %arg9[%c0_157, %c785] : memref<8x1280xf32, #tpu.memory_space<vmem>>, vector<8x384xf32>
    %c48_158 = arith.constant 48 : index
    %c384_159 = arith.constant 384 : index
    %105 = vector.load %arg10[%c48_158, %c384_159] : memref<72x768xf32, #tpu.memory_space<vmem>>, vector<8x384xf32>
    tpu.vector_store %arg10[%c48_158, %c384_159], %104 {strides = array<i32>} : memref<72x768xf32, #tpu.memory_space<vmem>>, vector<8x384xf32>,
    %c0_160 = arith.constant 0 : index
    %c786 = arith.constant 786 : index
    %106 = vector.load %arg9[%c0_160, %c786] : memref<8x1280xf32, #tpu.memory_space<vmem>>, vector<8x384xf32>
    %c56_161 = arith.constant 56 : index
    %c384_162 = arith.constant 384 : index
    %107 = vector.load %arg10[%c56_161, %c384_162] : memref<72x768xf32, #tpu.memory_space<vmem>>, vector<8x384xf32>
    tpu.vector_store %arg10[%c56_161, %c384_162], %106 {strides = array<i32>} : memref<72x768xf32, #tpu.memory_space<vmem>>, vector<8x384xf32>,
    %c0_163 = arith.constant 0 : index
    %c787 = arith.constant 787 : index
    %108 = vector.load %arg9[%c0_163, %c787] : memref<8x1280xf32, #tpu.memory_space<vmem>>, vector<8x384xf32>
    %c64_164 = arith.constant 64 : index
    %c384_165 = arith.constant 384 : index
    %109 = vector.load %arg10[%c64_164, %c384_165] : memref<72x768xf32, #tpu.memory_space<vmem>>, vector<8x384xf32>
    tpu.vector_store %arg10[%c64_164, %c384_165], %108 {strides = array<i32>} : memref<72x768xf32, #tpu.memory_space<vmem>>, vector<8x384xf32>,
    %c0_166 = arith.constant 0 : index
    %c0_167 = arith.constant 0 : index
    %110 = vector.load %arg3[%c0_166, %c0_167] : memref<4x72xf32, #tpu.memory_space<vmem>>, vector<4x72xf32>
    %c0_168 = arith.constant 0 : index
    %c0_169 = arith.constant 0 : index
    %111 = vector.load %arg10[%c0_168, %c0_169] : memref<72x768xf32, #tpu.memory_space<vmem>>, vector<72x768xf32>
    %cst_170 = arith.constant dense<0.000000e+00> : vector<4x768xf32>
    %112 = tpu.matmul %110, %111, %cst_170 {dimension_numbers = #tpu.dot_dimension_numbers<[1], [0], [0], [1], [0, 0, 1, 1], [], []>} : vector<4x72xf32>, vector<72x768xf32>, vector<4x768xf32> -> vector<4x768xf32>
    %c0_171 = arith.constant 0 : index
    %c0_172 = arith.constant 0 : index
    %113 = vector.load %arg5[%c0_171, %c0_172] : memref<4x1xf32, #tpu.memory_space<vmem>>, vector<4x1xf32>
    %114 = vector.broadcast %113 : vector<4x1xf32> to vector<4x768xf32>
    %115 = arith.addf %112, %114 : vector<4x768xf32>
    %cst_173 = arith.constant 0.000000e+00 : f32
    %116 = vector.broadcast %cst_173 : f32 to vector<4x768xf32>
    %117 = arith.maximumf %115, %116 : vector<4x768xf32>
    %c0_174 = arith.constant 0 : index
    %c0_175 = arith.constant 0 : index
    %c0_176 = arith.constant 0 : index
    %c128_177 = arith.constant 128 : index
    %118 = vector.load %arg1[%c0_174, %c0_175, %c0_176, %c128_177] : memref<1x2x4x640xf32, #tpu.memory_space<vmem>>, vector<1x1x4x384xf32>
    %119 = vector.shape_cast %118 : vector<1x1x4x384xf32> to vector<4x384xf32>
    %120 = vector.extract_strided_slice %117 {offsets = [0, 0], sizes = [4, 384], strides = [1, 1]} : vector<4x768xf32> to vector<4x384xf32>
    %121 = arith.addf %119, %120 : vector<4x384xf32>
    %c0_178 = arith.constant 0 : index
    %c0_179 = arith.constant 0 : index
    %c0_180 = arith.constant 0 : index
    %c0_181 = arith.constant 0 : index
    %122 = vector.load %arg7[%c0_178, %c0_179, %c0_180, %c0_181] : memref<1x2x4x384xf32, #tpu.memory_space<vmem>>, vector<1x1x4x384xf32>
    %123 = vector.shape_cast %122 : vector<1x1x4x384xf32> to vector<4x384xf32>
    %124 = vector.shape_cast %121 : vector<4x384xf32> to vector<1x1x4x384xf32>
    tpu.vector_store %arg7[%c0_178, %c0_179, %c0_180, %c0_181], %124 {strides = array<i32>} : memref<1x2x4x384xf32, #tpu.memory_space<vmem>>, vector<1x1x4x384xf32>,
    %c0_182 = arith.constant 0 : index
    %c1_183 = arith.constant 1 : index
    %c0_184 = arith.constant 0 : index
    %c128_185 = arith.constant 128 : index
    %125 = vector.load %arg1[%c0_182, %c1_183, %c0_184, %c128_185] : memref<1x2x4x640xf32, #tpu.memory_space<vmem>>, vector<1x1x4x384xf32>
    %126 = vector.shape_cast %125 : vector<1x1x4x384xf32> to vector<4x384xf32>
    %127 = vector.extract_strided_slice %117 {offsets = [0, 384], sizes = [4, 384], strides = [1, 1]} : vector<4x768xf32> to vector<4x384xf32>
    %128 = arith.addf %126, %127 : vector<4x384xf32>
    %c0_186 = arith.constant 0 : index
    %c1_187 = arith.constant 1 : index
    %c0_188 = arith.constant 0 : index
    %c0_189 = arith.constant 0 : index
    %129 = vector.load %arg7[%c0_186, %c1_187, %c0_188, %c0_189] : memref<1x2x4x384xf32, #tpu.memory_space<vmem>>, vector<1x1x4x384xf32>
    %130 = vector.shape_cast %129 : vector<1x1x4x384xf32> to vector<4x384xf32>
    %131 = vector.shape_cast %128 : vector<4x384xf32> to vector<1x1x4x384xf32>
    tpu.vector_store %arg7[%c0_186, %c1_187, %c0_188, %c0_189], %131 {strides = array<i32>} : memref<1x2x4x384xf32, #tpu.memory_space<vmem>>, vector<1x1x4x384xf32>,
    return
  }
  func.func @transform_0(%arg0: i32) -> (i32, i32, i32, i32) {
    %c0_i32 = arith.constant 0 : i32
    %c0_i32_0 = arith.constant 0 : i32
    %c0_i32_1 = arith.constant 0 : i32
    %c0_i32_2 = arith.constant 0 : i32
    return %arg0, %c0_i32, %c0_i32_0, %c0_i32_1 : i32, i32, i32, i32
  }
  func.func @transform_1(%arg0: i32) -> (i32, i32) {
    %c0_i32 = arith.constant 0 : i32
    %c0_i32_0 = arith.constant 0 : i32
    %c0_i32_1 = arith.constant 0 : i32
    return %c0_i32, %c0_i32_0 : i32, i32
  }
  func.func @transform_2(%arg0: i32) -> (i32, i32) {
    %c0_i32 = arith.constant 0 : i32
    %c0_i32_0 = arith.constant 0 : i32
    %c0_i32_1 = arith.constant 0 : i32
    return %c0_i32, %c0_i32_0 : i32, i32
  }
  func.func @transform_3(%arg0: i32) -> (i32, i32) {
    %c0_i32 = arith.constant 0 : i32
    %c0_i32_0 = arith.constant 0 : i32
    %c0_i32_1 = arith.constant 0 : i32
    return %c0_i32, %c0_i32_0 : i32, i32
  }
  func.func @transform_4(%arg0: i32) -> (i32, i32) {
    %c0_i32 = arith.constant 0 : i32
    %c0_i32_0 = arith.constant 0 : i32
    %c0_i32_1 = arith.constant 0 : i32
    return %c0_i32, %c0_i32_0 : i32, i32
  }
  func.func @transform_5(%arg0: i32) -> (i32, i32) {
    %c0_i32 = arith.constant 0 : i32
    %c0_i32_0 = arith.constant 0 : i32
    %c0_i32_1 = arith.constant 0 : i32
    return %c0_i32, %c0_i32_0 : i32, i32
  }
  func.func @transform_6(%arg0: i32) -> (i32, i32, i32, i32) {
    %c0_i32 = arith.constant 0 : i32
    %c0_i32_0 = arith.constant 0 : i32
    %c0_i32_1 = arith.constant 0 : i32
    %c0_i32_2 = arith.constant 0 : i32
    return %arg0, %c0_i32, %c0_i32_0, %c0_i32_1 : i32, i32, i32, i32
  }
}

</mosaic_0001>

<bundles_post_ra>
// kernel: resblock_pallas.1
= control target key start
LH: loop header
LB: loop body
LE: loop exit
PB: predicated region body
PF: predicated region fallthrough
CT: control target
= control target key end

     0   :  { %s1561_s27 = smov 109   ;;  %s1562_s28 = smov 111   ;;  %v1569_v19 = vmov 0.0   ;;  %vm213_vm0 = vcmask 891904   ;;  %vm165_vm1 = vcmask 908288   ;;  %v1570_v36 = vmov 0   ;;  %s2121_s0 = inlined_call_operand.vmem [shape: f32[1,2,4,640], index: 0, kind: input, shape index: {}]   ;;  %s2122_s3 = inlined_call_operand.vmem [shape: f32[8,1], index: 3, kind: input, shape index: {}]   ;;  %s2123_s1 = inlined_call_operand.vmem [shape: f32[8,36], index: 1, kind: input, shape index: {}]   ;;  %s2124_s5 = inlined_call_operand.vmem [shape: f32[1,768], index: 5, kind: input, shape index: {}]   ;;  %s2125_s4 = inlined_call_operand.vmem [shape: f32[4,1], index: 4, kind: input, shape index: {}]   ;;  %s2126_s2 = inlined_call_operand.vmem [shape: f32[4,72], index: 2, kind: input, shape index: {}]   ;;  %s2127_s6 = inlined_call_operand.vmem [shape: f32[1,2,4,384], index: 6, kind: output, shape index: {}]  }
   0x1   :  { %v200_v0 = vld [vmem:[%s2121_s0 + $0xc] sm:$0xff]  ;;  %v199_v1 = vld [vmem:[%s2121_s0 + $0x4] sm:$0xff]  ;;  %v1480_v2 = vld [vmem:[%s2121_s0 + $0x18] sm:$0xff]  ;;  %s1563_s29 = smov 110   ;;  %s1564_s30 = smov 127   ;;  %540 = vmatprep.mubr.f32.mxu0 %v1569_v19  ;;  %611 = vmatprep.mubr.f32.mxu1 %v1569_v19  ;;  %vm189_vm2 = vcmask 900096  }
   0x2   :  { %209 = vrot.lane.b32.xlu0 %v200_v0, %s1561_s27  ;;  %205 = vrot.lane.b32.xlu1 %v199_v1, %s1561_s27  ;;  %v203_v3 = vcombine.high %v199_v1, %v199_v1  ;;  %124 = vst [vmem:[#allocation2 + $0x60] sm:$0xf] %v199_v1  ;;  %321 = vst [vmem:[#allocation2 + $0x40] sm:$0xf] %v1480_v2  ;;  %v397_v4 = vcombine.high %v1480_v2, %v1480_v2  ;;  %v71_v9 = vld [vmem:[%s2121_s0] sm:$0xff]  ;;  %s1565_s9 = smov 17  }
   0x3   :  { %v180_v5 = vcombine.low %v200_v0, %v200_v0  ;;  %v204_v6 = vcombine.high %v200_v0, %v200_v0  ;;  %v179_v7 = vcombine.low %v199_v1, %v199_v1  ;;  %v374_v8 = vcombine.low %v1480_v2, %v1480_v2  ;;  %v72_v11 = vld [vmem:[%s2121_s0 + $0x8] sm:$0xff]  ;;  %s1566_s14 = smov 1   ;;  %s1567_s15 = smov 19   ;;  %v1468_v15 = vld [vmem:[%s2121_s0 + $0x14] sm:$0xff]  ;;  %v1481_v20 = vld [vmem:[%s2121_s0 + $0x20] sm:$0xff]  ;;  %1508 = vset.pattern.permute.xlu0 %v1570_v36 }
   0x4   :  { %125 = vst [vmem:[#allocation2 + $0x90] sm:$0xf] %v203_v3  ;;  %322 = vst [vmem:[#allocation2 + $0x48] sm:$0xf] %v397_v4  ;;  %v75_v10 = vcombine.high %v71_v9, %v71_v9  ;;  %v120_v12 = vld [vmem:[%s2121_s0 + $0xc] sm:$0xf]  ;;  %v100_v13 = vcombine.low %v72_v11, %v72_v11  ;;  %v99_v14 = vcombine.low %v71_v9, %v71_v9  ;;  %1544 = vset.pattern.permute.xlu1 %v1570_v36 }
   0x5   :  { %126 = vst [vmem:[#allocation2 + $0x20] sm:$0xf] %v120_v12  ;;  %s1568_s18 = smov 18   ;;  %v274_v16 = vcombine.high %v1468_v15, %v1468_v15  ;;  %v297_v17 = vcombine.low %v1468_v15, %v1468_v15  ;;  %v76_v18 = vcombine.high %v72_v11, %v72_v11  ;;  %v398_v21 = vcombine.high %v1481_v20, %v1481_v20  ;;  %v1473_v22 = vld [vmem:[%s2121_s0 + $0x20] sm:$0xf] }
   0x6   :  { %207 = vrot.lane.b32.xlu0 %v203_v3, %s1561_s27  ;;  %159 = vrot.lane.b32.xlu1 %v203_v3, %s1562_s28  ;;  %323 = vst [vmem:[#allocation2 + $0x58] sm:$0xf] %v1473_v22  ;;  %v375_v23 = vcombine.low %v1481_v20, %v1481_v20  ;;  %v1469_v24 = vld [vmem:[%s2121_s0 + $0x1c] sm:$0xff]  ;;  %vm457_vm3 = vcmask 1043456   ;;  %vm141_vm4 = vcmask 1039360   ;;  %vm85_vm5 = vcmask 138240  }
   0x7   :  { %v275_v25 = vcombine.high %v1469_v24, %v1469_v24  ;;  %v298_v26 = vcombine.low %v1469_v24, %v1469_v24  ;;  %v447_v37 = vld [vmem:[%s2122_s3] sm:$0xff]  ;;  %vm109_vm6 = vcmask 7168   ;;  %vm37_vm7 = vcmask 154624  }
   0x8   :  { %vm61_vm8 = vcmask 146432   ;;  %vm453_vm9 = vcmask 293888   ;;  %vm1216_vm10 = vcmask 588800  }
   0xa   :  { %161 = vrot.lane.b32.xlu0 %v200_v0, %s1562_s28  ;;  %183 = vrot.lane.b32.xlu1 %v199_v1, %s1563_s29 }
   0xe   :  { %185 = vrot.lane.b32.xlu0 %v180_v5, %s1563_s29  ;;  %399 = vrot.lane.b32.xlu1 %v1480_v2, %s1561_s27 }
  0x12   :  { %401 = vrot.lane.b32.xlu0 %v397_v4, %s1561_s27  ;;  %157 = vrot.lane.b32.xlu1 %v199_v1, %s1562_s28 }
  0x16   :  { %181 = vrot.lane.b32.xlu0 %v179_v7, %s1563_s29  ;;  %211 = vrot.lane.b32.xlu1 %v204_v6, %s1561_s27 }
  0x1a   :  { %137 = vrot.lane.b32.xlu1 %v180_v5, %s1564_s30  ;;  %135 = vrot.lane.b32.xlu0 %v199_v1, %s1564_s30 }
  0x1e   :  { %355 = vrot.lane.b32.xlu1 %v397_v4, %s1562_s28  ;;  %353 = vrot.lane.b32.xlu0 %v1480_v2, %s1562_s28 }
  0x22   :  { %378 = vrot.lane.b32.xlu1 %v1480_v2, %s1563_s29  ;;  %376 = vrot.lane.b32.xlu0 %v374_v8, %s1563_s29 }
  0x26   :  { %163 = vrot.lane.b32.xlu1 %v204_v6, %s1562_s28  ;;  %133 = vrot.lane.b32.xlu0 %v179_v7, %s1564_s30 }
  0x2a   :  { %187 = vrot.lane.b32.xlu0 %v200_v0, %s1563_s29  ;;  %79 = vrot.lane.b32.xlu1 %v75_v10, %s1565_s9 }
  0x2e   :  { %81 = vrot.lane.b32.xlu0 %v72_v11, %s1565_s9  ;;  %103 = vrot.lane.b32.xlu1 %v71_v9, %s1566_s14 }
  0x32   :  { %105 = vrot.lane.b32.xlu0 %v100_v13, %s1566_s14  ;;  %330 = vrot.lane.b32.xlu1 %v374_v8, %s1564_s30 }
  0x36   :  { %332 = vrot.lane.b32.xlu0 %v1480_v2, %s1564_s30  ;;  %77 = vrot.lane.b32.xlu1 %v71_v9, %s1565_s9 }
  0x3a   :  { %101 = vrot.lane.b32.xlu0 %v99_v14, %s1566_s14  ;;  %139 = vrot.lane.b32.xlu1 %v200_v0, %s1564_s30 }
  0x3e   :  { %33 = vrot.lane.b32.xlu1 %v72_v11, %s1567_s15  ;;  %31 = vrot.lane.b32.xlu0 %v75_v10, %s1567_s15 }
  0x42   :  { %57 = vrot.lane.b32.xlu1 %v100_v13, %s1568_s18  ;;  %55 = vrot.lane.b32.xlu0 %v71_v9, %s1568_s18 }
  0x46   :  { %278 = vrot.lane.b32.xlu1 %v274_v16, %s1565_s9  ;;  %276 = vrot.lane.b32.xlu0 %v1468_v15, %s1565_s9 }
  0x4a   :  { %301 = vrot.lane.b32.xlu1 %v1468_v15, %s1566_s14  ;;  %299 = vrot.lane.b32.xlu0 %v297_v17, %s1566_s14 }
  0x4e   :  { %53 = vrot.lane.b32.xlu1 %v99_v14, %s1568_s18  ;;  %29 = vrot.lane.b32.xlu0 %v71_v9, %s1567_s15 }
  0x52   :  { %107 = vrot.lane.b32.xlu1 %v72_v11, %s1566_s14  ;;  %83 = vrot.lane.b32.xlu0 %v76_v18, %s1565_s9 }
  0x56   :  { %232 = vrot.lane.b32.xlu1 %v274_v16, %s1567_s15  ;;  %230 = vrot.lane.b32.xlu0 %v1468_v15, %s1567_s15 }
  0x5a   :  { %255 = vrot.lane.b32.xlu1 %v1468_v15, %s1568_s18  ;;  %253 = vrot.lane.b32.xlu0 %v297_v17, %s1568_s18 }
  0x5e   :  { %59 = vrot.lane.b32.xlu1 %v72_v11, %s1568_s18  ;;  %35 = vrot.lane.b32.xlu0 %v76_v18, %s1567_s15 }
  0x62   :  { %405 = vrot.lane.b32.xlu1 %v398_v21, %s1561_s27  ;;  %403 = vrot.lane.b32.xlu0 %v1481_v20, %s1561_s27 }
  0x66   :  { %359 = vrot.lane.b32.xlu1 %v398_v21, %s1562_s28  ;;  %357 = vrot.lane.b32.xlu0 %v1481_v20, %s1562_s28 }
  0x6a   :  { %382 = vrot.lane.b32.xlu1 %v1481_v20, %s1563_s29  ;;  %380 = vrot.lane.b32.xlu0 %v375_v23, %s1563_s29 }
  0x6e   :  { %336 = vrot.lane.b32.xlu1 %v1481_v20, %s1564_s30  ;;  %334 = vrot.lane.b32.xlu0 %v375_v23, %s1564_s30 }
  0x72   :  { %282 = vrot.lane.b32.xlu1 %v275_v25, %s1565_s9  ;;  %280 = vrot.lane.b32.xlu0 %v1469_v24, %s1565_s9 }
  0x74   :  { %v210_v27 = vpop.permute.xlu0 %209  ;;  %v206_v28 = vpop.permute.xlu1 %205 }
  0x76   :  { %305 = vrot.lane.b32.xlu1 %v1469_v24, %s1566_s14  ;;  %303 = vrot.lane.b32.xlu0 %v298_v26, %s1566_s14 }
  0x78   :  { %v208_v29 = vpop.permute.xlu0 %207  ;;  %v160_v30 = vpop.permute.xlu1 %159 }
  0x79   :  { %v214_v31 = vsel %vm213_vm0, %v206_v28, %v208_v29  ;;  %v215_v32 = vsel %vm213_vm0, %v208_v29, %v210_v27 }
  0x7a   :  { %220 = vst [vmem:[#allocation2 + $0xc0] sm:$0xf] %v214_v31  ;;  %221 = vst [vmem:[#allocation2 + $0x78] sm:$0xf] %v215_v32  ;;  %236 = vrot.lane.b32.xlu1 %v275_v25, %s1567_s15  ;;  %234 = vrot.lane.b32.xlu0 %v1469_v24, %s1567_s15 }
  0x7c   :  { %v1702_v33 = vpop.permute.xlu0 %161  ;;  %v184_v34 = vpop.permute.xlu1 %183 }
  0x7d   :  { %v167_v35 = vsel %vm165_vm1, %v160_v30, %v1702_v33 }
  0x7e   :  { %173 = vst [vmem:[#allocation2 + $0xe8] sm:$0xf] %v167_v35  ;;  %259 = vrot.lane.b32.xlu1 %v1469_v24, %s1568_s18  ;;  %257 = vrot.lane.b32.xlu0 %v298_v26, %s1568_s18 }
  0x80   :  { %v186_v38 = vpop.permute.xlu0 %185  ;;  %v400_v39 = vpop.permute.xlu1 %399 }
  0x81   :  { %v191_v40 = vsel %vm189_vm2, %v184_v34, %v186_v38  ;;  %v442_v41 = vld [vmem:[#allocation2 + $0x78] sm:$0xf]  ;;  %v441_v42 = vld [vmem:[#allocation2 + $0xc0] sm:$0xf] }
  0x82   :  { %197 = vst [vmem:[#allocation2 + $0xe8] sm:$0xf0] %v191_v40  ;;  %1482 = vmatprep.subr.msk.mxu0 %vm457_vm3, %v442_v41  ;;  %450 = vperm.xlu0 %1508, %v447_v37  }
  0x83   :  { %1483 = vmatpush1.msk.msra.mxu0 %vm457_vm3, %v441_v42  ;;  %1515 = vrot.lane.b32.xlu1 %v1569_v19, %s1565_s9 }
  0x84   :  { %v1714_v43 = vpop.permute.xlu0 %401  ;;  %v158_v44 = vpop.permute.xlu1 %157 }
  0x85   :  { %v407_v45 = vsel %vm213_vm0, %v400_v39, %v1714_v43  ;;  %v166_v46 = vsel %vm165_vm1, %v158_v44, %v160_v30 }
  0x86   :  { %413 = vst [vmem:[#allocation2 + $0xb0] sm:$0xf] %v407_v45  ;;  %172 = vst [vmem:[#allocation2 + $0x28] sm:$0xf] %v166_v46  ;;  %1510 = vrot.lane.b32.xlu0 %v1569_v19, %s1566_s14 }
  0x87   :  { %751 = vrot.lane.b32.xlu1 %v1569_v19, %s1567_s15 }
  0x88   :  { %v182_v47 = vpop.permute.xlu0 %181  ;;  %v212_v48 = vpop.permute.xlu1 %211 }
  0x89   :  { %v190_v49 = vsel %vm189_vm2, %v182_v47, %v184_v34  ;;  %v216_v50 = vsel %vm213_vm0, %v210_v27, %v212_v48  ;;  %v436_v51 = vld [vmem:[#allocation2 + $0xe8] sm:$0xff] }
  0x8a   :  { %196 = vst [vmem:[#allocation2 + $0x28] sm:$0xf0] %v190_v49  ;;  %222 = vst [vmem:[#allocation2 + $0xd0] sm:$0xf] %v216_v50  ;;  %500 = vmatprep.subr.mxu0 %v436_v51  ;;  %1520 = vrot.lane.b32.xlu0 %v1569_v19, %s1568_s18 }
  0x8c   :  { %v138_v52 = vpop.permute.xlu1 %137  ;;  %v136_v53 = vpop.permute.xlu0 %135 }
  0x8d   :  { %v143_v54 = vsel %vm141_vm4, %v136_v53, %v138_v52  ;;  %v444_v55 = vld [vmem:[#allocation2 + $0xb0] sm:$0xf] }
  0x8e   :  { %149 = vst [vmem:[#allocation2 + $0x90] sm:$0xf0] %v143_v54  ;;  %1485 = vmatprep.subr.msk.mxu1 %vm457_vm3, %v444_v55  ;;  %1525 = vrot.lane.b32.xlu0 %v1569_v19, %s1561_s27  ;;  %v1782_v55 = vld [vmem:[%s2123_s1] sm:$0xff] }
  0x90   :  { %v1729_v56 = vpop.permute.xlu1 %355  ;;  %v354_v57 = vpop.permute.xlu0 %353 }
  0x91   :  { %v361_v58 = vsel %vm165_vm1, %v354_v57, %v1729_v56  ;;  %v435_v59 = vld [vmem:[#allocation2 + $0x28] sm:$0xff]  ;;  %v443_v60 = vld [vmem:[#allocation2 + $0xd0] sm:$0xf] }
  0x92   :  { %367 = vst [vmem:[#allocation2 + $0xa0] sm:$0xf] %v361_v58  ;;  %501 = vmatpush1.msra.mxu0 %v435_v59  ;;  %1486 = vmatpush1.msk.msra.mxu1 %vm457_vm3, %v443_v60 }
  0x93   :  { %1530 = vrot.lane.b32.xlu0 %v1569_v19, %s1563_s29 }
  0x94   :  { %v1736_v61 = vpop.permute.xlu1 %378  ;;  %v377_v62 = vpop.permute.xlu0 %376 }
  0x95   :  { %v384_v63 = vsel %vm189_vm2, %v377_v62, %v1736_v61  ;;  %v430_v0 = vld [vmem:[#allocation2 + $0x90] sm:$0xff] }
  0x96   :  { %390 = vst [vmem:[#allocation2 + $0xa0] sm:$0xf0] %v384_v63  ;;  %502 = vmatprep.subr.mxu0 %v430_v0 }
  0x97   :  { %1535 = vrot.lane.b32.xlu0 %v1569_v19, %s1562_s28 }
  0x98   :  { %v164_v1 = vpop.permute.xlu1 %163  ;;  %v134_v2 = vpop.permute.xlu0 %133 }
  0x99   :  { %v168_v3 = vsel %vm165_vm1, %v1702_v33, %v164_v1  ;;  %v142_v4 = vsel %vm141_vm4, %v134_v2, %v136_v53 }
  0x9a   :  { %174 = vst [vmem:[#allocation2 + $0x88] sm:$0xf] %v168_v3  ;;  %148 = vst [vmem:[#allocation2 + $0x60] sm:$0xf0] %v142_v4 }
  0x9b   :  { %1540 = vrot.lane.b32.xlu0 %v1569_v19, %s1564_s30 }
  0x9c   :  { %v188_v5 = vpop.permute.xlu0 %187  ;;  %v80_v6 = vpop.permute.xlu1 %79 }
  0x9d   :  { %v192_v7 = vsel %vm189_vm2, %v186_v38, %v188_v5  ;;  %v438_v8 = vld [vmem:[#allocation2 + $0xa0] sm:$0xff] }
  0x9e   :  { %198 = vst [vmem:[#allocation2 + $0x88] sm:$0xf0] %v192_v7  ;;  %571 = vmatprep.subr.mxu1 %v438_v8 }
  0x9f   :  { %957 = vrot.lane.b32.xlu0 %v1569_v19, %s1567_s15 }
  0xa0   :  { %v1750_v9 = vpop.permute.xlu0 %81  ;;  %v104_v10 = vpop.permute.xlu1 %103 }
  0xa1   :  { %v87_v11 = vsel %vm85_vm5, %v80_v6, %v1750_v9  ;;  %v429_v12 = vld [vmem:[#allocation2 + $0x60] sm:$0xff] }
  0xa2   :  { %93 = vst [vmem:[#allocation2 + $0x98] sm:$0xf] %v87_v11  ;;  %503 = vmatpush1.msra.mxu0 %v429_v12 }
  0xa4   :  { %v106_v13 = vpop.permute.xlu0 %105  ;;  %v331_v14 = vpop.permute.xlu1 %330 }
  0xa5   :  { %v111_v15 = vsel %vm109_vm6, %v104_v10, %v106_v13  ;;  %v437_v16 = vld [vmem:[#allocation2 + $0x88] sm:$0xff] }
  0xa6   :  { %117 = vst [vmem:[#allocation2 + $0x98] sm:$0xf0] %v111_v15  ;;  %572 = vmatpush1.msra.mxu1 %v437_v16 }
  0xa8   :  { %v1755_v17 = vpop.permute.xlu0 %332  ;;  %v78_v18 = vpop.permute.xlu1 %77 }
  0xa9   :  { %v338_v20 = vsel %vm141_vm4, %v331_v14, %v1755_v17  ;;  %v86_v21 = vsel %vm85_vm5, %v78_v18, %v80_v6 }
  0xaa   :  { %344 = vst [vmem:[#allocation2 + $0x40] sm:$0xf0] %v338_v20  ;;  %92 = vst [vmem:[#allocation2 + $0x30] sm:$0xf] %v86_v21 }
  0xac   :  { %v102_v22 = vpop.permute.xlu0 %101  ;;  %v140_v23 = vpop.permute.xlu1 %139 }
  0xad   :  { %v110_v24 = vsel %vm109_vm6, %v102_v22, %v104_v10  ;;  %v144_v25 = vsel %vm141_vm4, %v138_v52, %v140_v23  ;;  %v424_v26 = vld [vmem:[#allocation2 + $0x98] sm:$0xff] }
  0xae   :  { %116 = vst [vmem:[#allocation2 + $0x30] sm:$0xf0] %v110_v24  ;;  %150 = vst [vmem:[#allocation2 + $0x20] sm:$0xf0] %v144_v25  ;;  %504 = vmatprep.subr.mxu0 %v424_v26 }
  0xb0   :  { %v34_v27 = vpop.permute.xlu1 %33  ;;  %v32_v28 = vpop.permute.xlu0 %31 }
  0xb1   :  { %v39_v29 = vsel %vm37_vm7, %v32_v28, %v34_v27  ;;  %v432_v30 = vld [vmem:[#allocation2 + $0x40] sm:$0xff] }
  0xb2   :  { %45 = vst [vmem:[#allocation2] sm:$0xf] %v39_v29  ;;  %573 = vmatprep.subr.mxu1 %v432_v30 }
  0xb4   :  { %v58_v31 = vpop.permute.xlu1 %57  ;;  %v56_v32 = vpop.permute.xlu0 %55 }
  0xb5   :  { %v63_v33 = vsel %vm61_vm8, %v56_v32, %v58_v31  ;;  %v423_v34 = vld [vmem:[#allocation2 + $0x30] sm:$0xff]  ;;  %v431_v35 = vld [vmem:[#allocation2 + $0x20] sm:$0xff] }
  0xb6   :  { %69 = vst [vmem:[#allocation2] sm:$0xf0] %v63_v33  ;;  %505 = vmatpush1.msra.mxu0 %v423_v34  ;;  %574 = vmatpush1.msra.mxu1 %v431_v35 }
  0xb8   :  { %v1764_v36 = vpop.permute.xlu1 %278  ;;  %v277_v37 = vpop.permute.xlu0 %276 }
  0xb9   :  { %v284_v38 = vsel %vm85_vm5, %v277_v37, %v1764_v36 }
  0xba   :  { %290 = vst [vmem:[#allocation2 + $0xa8] sm:$0xf] %v284_v38 }
  0xbc   :  { %v1768_v39 = vpop.permute.xlu1 %301  ;;  %v300_v40 = vpop.permute.xlu0 %299 }
  0xbd   :  { %v307_v41 = vsel %vm109_vm6, %v300_v40, %v1768_v39  ;;  %v418_v42 = vld [vmem:[#allocation2] sm:$0xff] }
  0xbe   :  { %313 = vst [vmem:[#allocation2 + $0xa8] sm:$0xf0] %v307_v41  ;;  %506 = vmatprep.subr.mxu0 %v418_v42 }
  0xc0   :  { %v54_v44 = vpop.permute.xlu1 %53  ;;  %v30_v45 = vpop.permute.xlu0 %29 }
  0xc1   :  { %v62_v46 = vsel %vm61_vm8, %v54_v44, %v56_v32  ;;  %v38_v47 = vsel %vm37_vm7, %v30_v45, %v32_v28 }
  0xc2   :  { %68 = vst [vmem:[#allocation2 + $0x80] sm:$0xf0] %v62_v46  ;;  %44 = vst [vmem:[#allocation2 + $0x80] sm:$0xf] %v38_v47  ;;  %v697_v47 = vlaneseq }
  0xc4   :  { %v108_v48 = vpop.permute.xlu1 %107  ;;  %v84_v49 = vpop.permute.xlu0 %83 }
  0xc5   :  { %v112_v50 = vsel %vm109_vm6, %v106_v13, %v108_v48  ;;  %v88_v51 = vsel %vm85_vm5, %v1750_v9, %v84_v49  ;;  %v426_v52 = vld [vmem:[#allocation2 + $0xa8] sm:$0xff]  ;;  %v698_v48 = vshrl.u32 %v697_v47, 7 }
  0xc6   :  { %118 = vst [vmem:[#allocation2 + $0xc8] sm:$0xf0] %v112_v50  ;;  %94 = vst [vmem:[#allocation2 + $0xc8] sm:$0xf] %v88_v51  ;;  %575 = vmatprep.subr.mxu1 %v426_v52  ;;  %v695_v50 = vld [vmem:[%s2124_s5] sm:$0x3f] }
  0xc7   :  { %v719_v49 = vsub.s32 5, %v698_v48  ;;  %v699_v52 = vsub.s32 0, %v698_v48 }
  0xc8   :  { %v1777_v53 = vpop.permute.xlu1 %232  ;;  %v231_v54 = vpop.permute.xlu0 %230 }
  0xc9   :  { %v238_v57 = vsel %vm37_vm7, %v231_v54, %v1777_v53  ;;  %v417_v58 = vld [vmem:[#allocation2 + $0x80] sm:$0xff]  ;;  %v1834_v51 = vrot.slane %v695_v50, %v719_v49 }
  0xca   :  { %244 = vst [vmem:[#allocation2 + $0x70] sm:$0xf] %v238_v57  ;;  %507 = vmatpush1.msra.mxu0 %v417_v58  ;;  %v700_v57 = vrot.slane %v695_v50, %v699_v52 }
  0xcb   :  { %1484 = vmatmul.mubr.msk.f32.vlgmr.msra.gmra.mxu0 %vm453_vm9, %v1782_v55 }
  0xcc   :  { %v1788_v59 = vpop.permute.xlu1 %255  ;;  %v254_v60 = vpop.permute.xlu0 %253  ;;  %682 = vmatprep.mubr.f32.mxu0 %v1569_v19 }
  0xcd   :  { %v261_v62 = vsel %vm61_vm8, %v254_v60, %v1788_v59  ;;  %v425_v63 = vld [vmem:[#allocation2 + $0xc8] sm:$0xff]  ;;  %v707_v60 = vsub.s32 2, %v698_v48 }
  0xce   :  { %267 = vst [vmem:[#allocation2 + $0x70] sm:$0xf0] %v261_v62  ;;  %576 = vmatpush1.msra.mxu1 %v425_v63 }
  0xd0   :  { %v60_v0 = vpop.permute.xlu1 %59  ;;  %v36_v1 = vpop.permute.xlu0 %35 }
  0xd1   :  { %v64_v2 = vsel %vm61_vm8, %v58_v31, %v60_v0  ;;  %v40_v3 = vsel %vm37_vm7, %v34_v27, %v36_v1  ;;  %v708_v0 = vrot.slane %v695_v50, %v707_v60 }
  0xd2   :  { %70 = vst [vmem:[#allocation2 + $0xd8] sm:$0xf0] %v64_v2  ;;  %46 = vst [vmem:[#allocation2 + $0xd8] sm:$0xf] %v40_v3 }
  0xd4   :  { %v406_v4 = vpop.permute.xlu1 %405  ;;  %v404_v5 = vpop.permute.xlu0 %403 }
  0xd5   :  { %v408_v6 = vsel %vm213_vm0, %v1714_v43, %v404_v5  ;;  %v409_v7 = vsel %vm213_vm0, %v404_v5, %v406_v4  ;;  %v420_v8 = vld [vmem:[#allocation2 + $0x70] sm:$0xff]  ;;  %v703_v5 = vsub.s32 1, %v698_v48 }
  0xd6   :  { %414 = vst [vmem:[#allocation2 + $0xe0] sm:$0xf] %v408_v6  ;;  %415 = vst [vmem:[#allocation2 + $0x38] sm:$0xf] %v409_v7  ;;  %577 = vmatprep.subr.mxu1 %v420_v8 }
  0xd7   :  { %v704_v7 = vrot.slane %v695_v50, %v703_v5 }
  0xd8   :  { %v360_v9 = vpop.permute.xlu1 %359  ;;  %v358_v10 = vpop.permute.xlu0 %357 }
  0xd9   :  { %v362_v11 = vsel %vm165_vm1, %v1729_v56, %v358_v10  ;;  %v363_v12 = vsel %vm165_vm1, %v358_v10, %v360_v9  ;;  %v419_v13 = vld [vmem:[#allocation2 + $0xd8] sm:$0xff] }
  0xda   :  { %368 = vst [vmem:[#allocation2 + $0xb8] sm:$0xf] %v362_v11  ;;  %369 = vst [vmem:[#allocation2 + $0x50] sm:$0xf] %v363_v12  ;;  %578 = vmatpush1.msra.mxu1 %v419_v13  ;;  %v711_v11 = vsub.s32 3, %v698_v48 }
  0xdb   :  { %1487 = vmatmul.mubr.msk.f32.vlgmr.msra.gmra.mxu1 %vm453_vm9, %v1782_v55 }
  0xdc   :  { %v383_v43 = vpop.permute.xlu1 %382  ;;  %v381_v14 = vpop.permute.xlu0 %380  ;;  %1284 = vmatprep.mubr.f32.mxu1 %v1569_v19  ;;  %v712_v13 = vrot.slane %v695_v50, %v711_v11 }
  0xdd   :  { %v385_v15 = vsel %vm189_vm2, %v1736_v61, %v381_v14  ;;  %v386_v16 = vsel %vm189_vm2, %v381_v14, %v383_v43  ;;  %v446_v18 = vld [vmem:[#allocation2 + $0x38] sm:$0xf]  ;;  %v445_v56 = vld [vmem:[#allocation2 + $0xe0] sm:$0xf] }
  0xde   :  { %391 = vst [vmem:[#allocation2 + $0xb8] sm:$0xf0] %v385_v15  ;;  %392 = vst [vmem:[#allocation2 + $0x50] sm:$0xf0] %v386_v16  ;;  %1488 = vmatprep.subr.msk.mxu0 %vm457_vm3, %v446_v18  ;;  %v715_v16 = vsub.s32 4, %v698_v48 }
  0xdf   :  { %1489 = vmatpush1.msk.msra.mxu0 %vm457_vm3, %v445_v56 }
  0xe0   :  { %v337_v20 = vpop.permute.xlu1 %336  ;;  %v335_v21 = vpop.permute.xlu0 %334  ;;  %v716_v56 = vrot.slane %v695_v50, %v715_v16 }
  0xe1   :  { %v339_v22 = vsel %vm141_vm4, %v1755_v17, %v335_v21  ;;  %v340_v23 = vsel %vm141_vm4, %v335_v21, %v337_v20 }
  0xe2   :  { %345 = vst [vmem:[#allocation2 + $0x48] sm:$0xf0] %v339_v22  ;;  %346 = vst [vmem:[#allocation2 + $0x58] sm:$0xf0] %v340_v23 }
  0xe4   :  { %v283_v61 = vpop.permute.xlu1 %282  ;;  %v281_v24 = vpop.permute.xlu0 %280 }
  0xe5   :  { %v285_v25 = vsel %vm85_vm5, %v1764_v36, %v281_v24  ;;  %v286_v26 = vsel %vm85_vm5, %v281_v24, %v283_v61  ;;  %v440_v27 = vld [vmem:[#allocation2 + $0x50] sm:$0xff]  ;;  %v439_v28 = vld [vmem:[#allocation2 + $0xb8] sm:$0xff] }
  0xe6   :  { %291 = vst [vmem:[#allocation2 + $0x10] sm:$0xf] %v285_v25  ;;  %292 = vst [vmem:[#allocation2 + $0x68] sm:$0xf] %v286_v26  ;;  %642 = vmatprep.subr.mxu0 %v440_v27 }
  0xe7   :  { %643 = vmatpush1.msra.mxu0 %v439_v28 }
  0xe8   :  { %v306_v29 = vpop.permute.xlu1 %305  ;;  %v304_v30 = vpop.permute.xlu0 %303 }
  0xe9   :  { %v308_v17 = vsel %vm109_vm6, %v1768_v39, %v304_v30  ;;  %v309_v31 = vsel %vm109_vm6, %v304_v30, %v306_v29  ;;  %v434_v32 = vld [vmem:[#allocation2 + $0x58] sm:$0xff]  ;;  %v433_v33 = vld [vmem:[#allocation2 + $0x48] sm:$0xff] }
  0xea   :  { %314 = vst [vmem:[#allocation2 + $0x10] sm:$0xf0] %v308_v17  ;;  %315 = vst [vmem:[#allocation2 + $0x68] sm:$0xf0] %v309_v31  ;;  %644 = vmatprep.subr.mxu0 %v434_v32  ;;  %v1210_v31 = vld [vmem:[%s2125_s4] sm:$0xf] }
  0xeb   :  { %645 = vmatpush1.msra.mxu0 %v433_v33 }
  0xec   :  { %v237_v34 = vpop.permute.xlu1 %236  ;;  %v235_v35 = vpop.permute.xlu0 %234 }
  0xed   :  { %v239_v36 = vsel %vm37_vm7, %v1777_v53, %v235_v35  ;;  %v240_v37 = vsel %vm37_vm7, %v235_v35, %v237_v34 }
  0xee   :  { %245 = vst [vmem:[#allocation2 + $0x8] sm:$0xf] %v239_v36  ;;  %246 = vst [vmem:[#allocation2 + $0x18] sm:$0xf] %v240_v37 }
  0xf0   :  { %v260_v38 = vpop.permute.xlu1 %259  ;;  %v258_v40 = vpop.permute.xlu0 %257 }
  0xf1   :  { %v262_v39 = vsel %vm61_vm8, %v1788_v59, %v258_v40  ;;  %v263_v41 = vsel %vm61_vm8, %v258_v40, %v260_v38  ;;  %v428_v42 = vld [vmem:[#allocation2 + $0x68] sm:$0xff]  ;;  %v427_v44 = vld [vmem:[#allocation2 + $0x10] sm:$0xff] }
  0xf2   :  { %268 = vst [vmem:[#allocation2 + $0x8] sm:$0xf0] %v262_v39  ;;  %269 = vst [vmem:[#allocation2 + $0x18] sm:$0xf0] %v263_v41  ;;  %646 = vmatprep.subr.mxu0 %v428_v42 }
  0xf3   :  { %647 = vmatpush1.msra.mxu0 %v427_v44 }
  0xf5   :  { %v1955_v30 = vpop.permute.xlu1 %1515 }
  0xf9   :  { %v422_v45 = vld [vmem:[#allocation2 + $0x18] sm:$0xff]  ;;  %v421_v46 = vld [vmem:[#allocation2 + $0x8] sm:$0xff]  ;;  %v1964_v32 = vpop.permute.xlu1 %751 }
  0xfa   :  { %648 = vmatprep.subr.mxu0 %v422_v45 }
  0xfb   :  { %649 = vmatpush1.msra.mxu0 %v421_v46 }
  0xfc   :  { %1490 = vmatmul.mubr.msk.f32.vlgmr.msra.gmra.mxu0 %vm453_vm9, %v1782_v55 }
  0xfd   :  { %1355 = vmatprep.mubr.f32.mxu0 %v1569_v19  ;;  %v451_v53 = vpop.permute.xlu0 %450 }
 0x101   :  { %v1919_v24 = vpop.permute.xlu0 %1510 }
 0x105   :  { %v1929_v25 = vpop.permute.xlu0 %1520 }
 0x109   :  { %v1935_v26 = vpop.permute.xlu0 %1525 }
 0x10a   :  { %v1527_v16 = vunpack.i.l.bf16 %v1935_v26 }
 0x10d   :  { %v1941_v27 = vpop.permute.xlu0 %1530 }
 0x111   :  { %v1945_v28 = vpop.permute.xlu0 %1535 }
 0x115   :  { %v1951_v29 = vpop.permute.xlu0 %1540 }
 0x119   :  { %v1957_v17 = vpop.permute.xlu0 %957 }
 0x18b   :  { %v542_v54 = vpop.f32.mrf.mxu0 }
 0x18c   :  { %v543_v55 = vadd.f32 %v542_v54, %v451_v53 }
 0x18d   :  { %v544_v3 = vpop.f32.mrf.mxu0 }
 0x18e   :  { %v689_v58 = vmax.f32 %v543_v55, 0.0  ;;  %v545_v4 = vadd.f32 %v544_v3, %v451_v53 }
 0x190   :  { %v1836_v59 = vmul.f32 %v700_v57, %v689_v58  ;;  %v690_v6 = vmax.f32 %v545_v4, 0.0 }
 0x192   :  { %932 = vrot.lane.b32.xlu0 %v1836_v59, %s1561_s27  ;;  %v1862_v8 = vmul.f32 %v704_v7, %v690_v6  ;;  %v1512_v6 = vunpack.i.l.bf16 %v1919_v24 }
 0x19b   :  { %v613_v62 = vpop.f32.mrf.mxu1 }
 0x19c   :  { %v614_v63 = vadd.f32 %v613_v62, %v451_v53 }
 0x19d   :  { %v615_v9 = vpop.f32.mrf.mxu1 }
 0x19e   :  { %v691_v1 = vmax.f32 %v614_v63, 0.0  ;;  %v616_v10 = vadd.f32 %v615_v9, %v451_v53 }
 0x1a0   :  { %v1840_v2 = vmul.f32 %v708_v0, %v691_v1  ;;  %v692_v12 = vmax.f32 %v616_v10, 0.0  ;;  %v1517_v10 = vunpack.i.l.bf16 %v1955_v30 }
 0x1a2   :  { %936 = vrot.lane.b32.xlu1 %v1840_v2, %s1561_s27  ;;  %911 = vrot.lane.b32.xlu0 %v1840_v2, %s1563_s29  ;;  %v1876_v43 = vmul.f32 %v712_v13, %v692_v12 }
 0x1a6   :  { %907 = vrot.lane.b32.xlu1 %v1836_v59, %s1563_s29  ;;  %882 = vrot.lane.b32.xlu0 %v1836_v59, %s1562_s28 }
 0x1aa   :  { %886 = vrot.lane.b32.xlu1 %v1840_v2, %s1562_s28  ;;  %861 = vrot.lane.b32.xlu0 %v1840_v2, %s1564_s30 }
 0x1ae   :  { %857 = vrot.lane.b32.xlu1 %v1836_v59, %s1564_s30  ;;  %828 = vrot.lane.b32.xlu0 %v1836_v59, %s1566_s14 }
 0x1b2   :  { %803 = vrot.lane.b32.xlu1 %v1836_v59, %s1565_s9  ;;  %778 = vrot.lane.b32.xlu0 %v1836_v59, %s1568_s18 }
 0x1b6   :  { %753 = vrot.lane.b32.xlu1 %v1836_v59, %s1567_s15  ;;  %884 = vrot.lane.b32.xlu0 %v1862_v8, %s1562_s28 }
 0x1ba   :  { %832 = vrot.lane.b32.xlu1 %v1840_v2, %s1566_s14  ;;  %805 = vrot.lane.b32.xlu0 %v1862_v8, %s1565_s9 }
 0x1bc   :  { %v684_v14 = vpop.f32.mrf.mxu0 }
 0x1bd   :  { %v685_v15 = vadd.f32 %v684_v14, %v451_v53  ;;  %v1522_v14 = vunpack.i.l.bf16 %v1929_v25 }
 0x1be   :  { %807 = vrot.lane.b32.xlu1 %v1840_v2, %s1565_s9  ;;  %755 = vrot.lane.b32.xlu0 %v1862_v8, %s1567_s15  ;;  %v686_v21 = vpop.f32.mrf.mxu0 }
 0x1bf   :  { %v693_v18 = vmax.f32 %v685_v15, 0.0  ;;  %v687_v22 = vadd.f32 %v686_v21, %v451_v53  ;;  %v2022_v21 = vld [vmem:[%s2126_s2] sm:$0xf] }
 0x1c1   :  { %v1890_v20 = vmul.f32 %v716_v56, %v693_v18  ;;  %v694_v23 = vmax.f32 %v687_v22, 0.0 }
 0x1c2   :  { %782 = vrot.lane.b32.xlu1 %v1840_v2, %s1568_s18  ;;  %1034 = vrot.lane.b32.xlu0 %v1876_v43, %s1566_s14 }
 0x1c3   :  { %v1917_v61 = vmul.f32 %v1834_v51, %v694_v23 }
 0x1c6   :  { %934 = vrot.lane.b32.xlu1 %v1862_v8, %s1561_s27  ;;  %1009 = vrot.lane.b32.xlu0 %v1876_v43, %s1565_s9 }
 0x1ca   :  { %909 = vrot.lane.b32.xlu1 %v1862_v8, %s1563_s29  ;;  %984 = vrot.lane.b32.xlu0 %v1876_v43, %s1568_s18 }
 0x1ce   :  { %859 = vrot.lane.b32.xlu1 %v1862_v8, %s1564_s30  ;;  %1140 = vrot.lane.b32.xlu0 %v1890_v20, %s1561_s27 }
 0x1d2   :  { %830 = vrot.lane.b32.xlu1 %v1862_v8, %s1566_s14  ;;  %1115 = vrot.lane.b32.xlu0 %v1890_v20, %s1563_s29 }
 0x1d6   :  { %780 = vrot.lane.b32.xlu1 %v1862_v8, %s1568_s18  ;;  %1090 = vrot.lane.b32.xlu0 %v1890_v20, %s1562_s28 }
 0x1da   :  { %1138 = vrot.lane.b32.xlu1 %v1876_v43, %s1561_s27  ;;  %1065 = vrot.lane.b32.xlu0 %v1890_v20, %s1564_s30 }
 0x1de   :  { %1113 = vrot.lane.b32.xlu1 %v1876_v43, %s1563_s29  ;;  %986 = vrot.lane.b32.xlu0 %v1890_v20, %s1568_s18 }
 0x1e2   :  { %1088 = vrot.lane.b32.xlu1 %v1876_v43, %s1562_s28  ;;  %757 = vrot.lane.b32.xlu0 %v1840_v2, %s1567_s15 }
 0x1e6   :  { %1063 = vrot.lane.b32.xlu1 %v1876_v43, %s1564_s30  ;;  %1038 = vrot.lane.b32.xlu0 %v1917_v61, %s1566_s14 }
 0x1ea   :  { %1036 = vrot.lane.b32.xlu1 %v1890_v20, %s1566_s14  ;;  %1013 = vrot.lane.b32.xlu0 %v1917_v61, %s1565_s9 }
 0x1ee   :  { %1011 = vrot.lane.b32.xlu1 %v1890_v20, %s1565_s9  ;;  %963 = vrot.lane.b32.xlu0 %v1917_v61, %s1567_s15 }
 0x1f2   :  { %1142 = vrot.lane.b32.xlu1 %v1917_v61, %s1561_s27 }
 0x1f6   :  { %1117 = vrot.lane.b32.xlu1 %v1917_v61, %s1563_s29 }
 0x1fa   :  { %1092 = vrot.lane.b32.xlu1 %v1917_v61, %s1562_s28 }
 0x1fe   :  { %1067 = vrot.lane.b32.xlu1 %v1917_v61, %s1564_s30 }
 0x202   :  { %959 = vrot.lane.b32.xlu1 %v1876_v43, %s1567_s15 }
 0x204   :  { %v933_v33 = vpop.permute.xlu0 %932 }
 0x206   :  { %988 = vrot.lane.b32.xlu1 %v1917_v61, %s1568_s18 }
 0x20a   :  { %961 = vrot.lane.b32.xlu1 %v1890_v20, %s1567_s15 }
 0x20e   :  { %1213 = vperm.xlu1 %1544, %v1210_v31  }
 0x214   :  { %v1966_v34 = vpop.permute.xlu1 %936  ;;  %v1968_v35 = vpop.permute.xlu0 %911 }
 0x218   :  { %v908_v36 = vpop.permute.xlu1 %907  ;;  %v883_v37 = vpop.permute.xlu0 %882 }
 0x21c   :  { %v1970_v38 = vpop.permute.xlu1 %886  ;;  %v1972_v40 = vpop.permute.xlu0 %861 }
 0x220   :  { %v858_v39 = vpop.permute.xlu1 %857  ;;  %v829_v41 = vpop.permute.xlu0 %828 }
 0x221   :  { %v834_v11 = vsel %vm109_vm6, %v1512_v6, %v829_v41 }
 0x224   :  { %v804_v42 = vpop.permute.xlu1 %803  ;;  %v779_v44 = vpop.permute.xlu0 %778 }
 0x225   :  { %v809_v15 = vsel %vm85_vm5, %v1517_v10, %v804_v42  ;;  %v784_v18 = vsel %vm61_vm8, %v1522_v14, %v779_v44 }
 0x228   :  { %v754_v45 = vpop.permute.xlu1 %753  ;;  %v885_v46 = vpop.permute.xlu0 %884 }
 0x229   :  { %v891_v63 = vsel %vm165_vm1, %v885_v46, %v1970_v38  ;;  %v890_v0 = vsel %vm165_vm1, %v883_v37, %v885_v46  ;;  %v759_v22 = vsel %vm37_vm7, %v1964_v32, %v754_v45  ;;  %v942_v37 = vsel %vm213_vm0, %v1966_v34, %v1527_v16 }
 0x22a   :  { %v1542_v46 = vunpack.i.l.bf16 %v1951_v29 }
 0x22c   :  { %v1974_v47 = vpop.permute.xlu1 %832  ;;  %v1976_v48 = vpop.permute.xlu0 %805 }
 0x22d   :  { %v810_v13 = vsel %vm85_vm5, %v804_v42, %v1976_v48 }
 0x230   :  { %v1978_v49 = vpop.permute.xlu1 %807  ;;  %v1980_v50 = vpop.permute.xlu0 %755 }
 0x231   :  { %v760_v56 = vsel %vm37_vm7, %v754_v45, %v1980_v50 }
 0x234   :  { %v1982_v51 = vpop.permute.xlu1 %782  ;;  %v1984_v52 = vpop.permute.xlu0 %1034 }
 0x238   :  { %v935_v53 = vpop.permute.xlu1 %934  ;;  %v1989_v57 = vpop.permute.xlu0 %1009 }
 0x239   :  { %v940_v54 = vsel %vm213_vm0, %v933_v33, %v935_v53  ;;  %v941_v55 = vsel %vm213_vm0, %v935_v53, %v1966_v34 }
 0x23a   :  { %1234 = vmatprep.subr.mxu1 %v941_v55 }
 0x23b   :  { %1235 = vmatpush1.msra.mxu1 %v940_v54 }
 0x23c   :  { %v910_v58 = vpop.permute.xlu1 %909  ;;  %v1997_v1 = vpop.permute.xlu0 %984 }
 0x23d   :  { %v915_v60 = vsel %vm189_vm2, %v908_v36, %v910_v58  ;;  %v916_v62 = vsel %vm189_vm2, %v910_v58, %v1968_v35  ;;  %v1532_v36 = vunpack.i.l.bf16 %v1941_v27  ;;  %v1513_v58 = vunpack.i.h.bf16 %v1919_v24 }
 0x23e   :  { %1236 = vmatprep.subr.mxu1 %v916_v62  ;;  %v1518_v62 = vunpack.i.h.bf16 %v1955_v30 }
 0x23f   :  { %1237 = vmatpush1.msra.mxu1 %v915_v60  ;;  %v917_v42 = vsel %vm189_vm2, %v1968_v35, %v1532_v36  ;;  %v867_v35 = vsel %vm141_vm4, %v1972_v40, %v1542_v46 }
 0x240   :  { %v860_v3 = vpop.permute.xlu1 %859  ;;  %1238 = vmatprep.subr.mxu1 %v891_v63  ;;  %v2008_v12 = vpop.permute.xlu0 %1140  ;;  %v1015_v24 = vsel %vm85_vm5, %v1518_v62, %v1989_v57 }
 0x241   :  { %v865_v4 = vsel %vm141_vm4, %v858_v39, %v860_v3  ;;  %1239 = vmatpush1.msra.mxu1 %v890_v0  ;;  %v866_v5 = vsel %vm141_vm4, %v860_v3, %v1972_v40  ;;  %v1523_v40 = vunpack.i.h.bf16 %v1929_v25  ;;  %v1528_v25 = vunpack.i.h.bf16 %v1935_v26 }
 0x242   :  { %1240 = vmatprep.subr.mxu1 %v866_v5  ;;  %v1538_v26 = vunpack.i.h.bf16 %v1945_v28 }
 0x243   :  { %1241 = vmatpush1.msra.mxu1 %v865_v4 }
 0x244   :  { %v831_v7 = vpop.permute.xlu1 %830  ;;  %1242 = vmatprep.subr.mxu1 %v1862_v8  ;;  %v1116_v23 = vpop.permute.xlu0 %1115 }
 0x245   :  { %1243 = vmatpush1.msra.mxu1 %v1836_v59  ;;  %v835_v9 = vsel %vm109_vm6, %v829_v41, %v831_v7  ;;  %v1537_v41 = vunpack.i.l.bf16 %v1945_v28  ;;  %v836_v63 = vsel %vm109_vm6, %v831_v7, %v1974_v47 }
 0x246   :  { %1244 = vmatprep.subr.mxu1 %v835_v9 }
 0x247   :  { %1245 = vmatpush1.msra.mxu1 %v834_v11  ;;  %v892_v53 = vsel %vm165_vm1, %v1970_v38, %v1537_v41  ;;  %v1040_v38 = vsel %vm109_vm6, %v1513_v58, %v1984_v52  ;;  %v1439_v41 = vld [vmem:[%s2121_s0 + $0x4] sm:$0xff] }
 0x248   :  { %v781_v8 = vpop.permute.xlu1 %780  ;;  %1246 = vmatprep.subr.mxu1 %v810_v13 }
 0x249   :  { %1247 = vmatpush1.msra.mxu1 %v809_v15  ;;  %v785_v59 = vsel %vm61_vm8, %v779_v44, %v781_v8  ;;  %v1091_v44 = vpop.permute.xlu0 %1090  ;;  %v786_v47 = vsel %vm61_vm8, %v781_v8, %v1982_v51 }
 0x24a   :  { %1248 = vmatprep.subr.mxu1 %v785_v59 }
 0x24b   :  { %1249 = vmatpush1.msra.mxu1 %v784_v18 }
 0x24c   :  { %v1139_v31 = vpop.permute.xlu1 %1138  ;;  %1250 = vmatprep.subr.mxu1 %v760_v56 }
 0x24d   :  { %1251 = vmatpush1.msra.mxu1 %v759_v22  ;;  %v1146_v33 = vsel %vm213_vm0, %v1139_v31, %v2008_v12 }
 0x24e   :  { %1305 = vmatprep.subr.mxu0 %v1146_v33  ;;  %1491 = vmatmul.mubr.msk.f32.vlgmr.msra.gmra.mxu1 %vm1216_vm10, %v2022_v21 }
 0x24f   :  { %1306 = vmatpush1.msra.mxu0 %v942_v37  ;;  %1426 = vmatprep.mubr.f32.mxu1 %v1569_v19  ;;  %v1066_v19 = vpop.permute.xlu0 %1065 }
 0x250   :  { %v1114_v32 = vpop.permute.xlu1 %1113 }
 0x251   :  { %v1121_v39 = vsel %vm189_vm2, %v1114_v32, %v1116_v23 }
 0x252   :  { %1307 = vmatprep.subr.mxu0 %v1121_v39 }
 0x253   :  { %1308 = vmatpush1.msra.mxu0 %v917_v42  ;;  %v987_v0 = vpop.permute.xlu0 %986 }
 0x254   :  { %v1089_v45 = vpop.permute.xlu1 %1088 }
 0x255   :  { %v1096_v34 = vsel %vm165_vm1, %v1089_v45, %v1091_v44 }
 0x256   :  { %1309 = vmatprep.subr.mxu0 %v1096_v34 }
 0x257   :  { %1310 = vmatpush1.msra.mxu0 %v892_v53  ;;  %v758_v7 = vpop.permute.xlu0 %757 }
 0x258   :  { %v1064_v54 = vpop.permute.xlu1 %1063 }
 0x259   :  { %v1071_v55 = vsel %vm141_vm4, %v1064_v54, %v1066_v19 }
 0x25a   :  { %1311 = vmatprep.subr.mxu0 %v1071_v55 }
 0x25b   :  { %1312 = vmatpush1.msra.mxu0 %v867_v35 }
 0x25c   :  { %v1037_v60 = vpop.permute.xlu1 %1036  ;;  %1313 = vmatprep.subr.mxu0 %v1876_v43  ;;  %v811_v43 = vsel %vm85_vm5, %v1976_v48, %v1978_v49  ;;  %v1533_v49 = vunpack.i.h.bf16 %v1941_v27  ;;  %v1039_v27 = vpop.permute.xlu0 %1038 }
 0x25d   :  { %1314 = vmatpush1.msra.mxu0 %v1840_v2  ;;  %v990_v2 = vsel %vm61_vm8, %v1523_v40, %v1997_v1  ;;  %v1042_v59 = vsel %vm109_vm6, %v1037_v60, %v1039_v27  ;;  %v1041_v16 = vsel %vm109_vm6, %v1984_v52, %v1037_v60  ;;  %v1495_v40 = vld [vmem:[%s2121_s0 + $0x20] sm:$0xf] }
 0x25e   :  { %1315 = vmatprep.subr.mxu0 %v1040_v38 }
 0x25f   :  { %1316 = vmatpush1.msra.mxu0 %v836_v63  ;;  %v1494_v63 = vld [vmem:[%s2121_s0 + $0x18] sm:$0xff] }
 0x260   :  { %v1012_v30 = vpop.permute.xlu1 %1011  ;;  %1317 = vmatprep.subr.mxu0 %v1015_v24  ;;  %v1014_v18 = vpop.permute.xlu0 %1013 }
 0x261   :  { %1318 = vmatpush1.msra.mxu0 %v811_v43 }
 0x262   :  { %1319 = vmatprep.subr.mxu0 %v990_v2 }
 0x263   :  { %1320 = vmatpush1.msra.mxu0 %v786_v47 }
 0x264   :  { %v1143_v3 = vpop.permute.xlu1 %1142  ;;  %v964_v52 = vpop.permute.xlu0 %963 }
 0x265   :  { %v1147_v4 = vsel %vm213_vm0, %v2008_v12, %v1143_v3  ;;  %v1148_v48 = vsel %vm213_vm0, %v1143_v3, %v1528_v25  ;;  %v1543_v12 = vunpack.i.h.bf16 %v1951_v29  ;;  %v761_v29 = vsel %vm37_vm7, %v1980_v50, %v758_v7 }
 0x266   :  { %1376 = vmatprep.subr.mxu1 %v1148_v48  ;;  %v991_v50 = vsel %vm61_vm8, %v1997_v1, %v987_v0 }
 0x267   :  { %1377 = vmatpush1.msra.mxu1 %v1147_v4 }
 0x268   :  { %v1118_v5 = vpop.permute.xlu1 %1117 }
 0x269   :  { %v1122_v6 = vsel %vm189_vm2, %v1116_v23, %v1118_v5  ;;  %v1123_v51 = vsel %vm189_vm2, %v1118_v5, %v1533_v49 }
 0x26a   :  { %1378 = vmatprep.subr.mxu1 %v1123_v51 }
 0x26b   :  { %1379 = vmatpush1.msra.mxu1 %v1122_v6 }
 0x26c   :  { %v1093_v9 = vpop.permute.xlu1 %1092 }
 0x26d   :  { %v1097_v10 = vsel %vm165_vm1, %v1091_v44, %v1093_v9  ;;  %v1098_v11 = vsel %vm165_vm1, %v1093_v9, %v1538_v26 }
 0x26e   :  { %1380 = vmatprep.subr.mxu1 %v1098_v11 }
 0x26f   :  { %1381 = vmatpush1.msra.mxu1 %v1097_v10 }
 0x270   :  { %v1068_v13 = vpop.permute.xlu1 %1067 }
 0x271   :  { %v1072_v14 = vsel %vm141_vm4, %v1066_v19, %v1068_v13  ;;  %v1073_v15 = vsel %vm141_vm4, %v1068_v13, %v1543_v12 }
 0x272   :  { %1382 = vmatprep.subr.mxu1 %v1073_v15 }
 0x273   :  { %1383 = vmatpush1.msra.mxu1 %v1072_v14 }
 0x274   :  { %v960_v8 = vpop.permute.xlu1 %959  ;;  %1384 = vmatprep.subr.mxu1 %v1917_v61  ;;  %v1017_v61 = vsel %vm85_vm5, %v1012_v30, %v1014_v18 }
 0x275   :  { %1385 = vmatpush1.msra.mxu1 %v1890_v20  ;;  %v965_v28 = vsel %vm37_vm7, %v1957_v17, %v960_v8  ;;  %v1016_v20 = vsel %vm85_vm5, %v1989_v57, %v1012_v30 }
 0x276   :  { %1321 = vmatprep.subr.mxu0 %v965_v28  ;;  %1386 = vmatprep.subr.mxu1 %v1042_v59 }
 0x277   :  { %1322 = vmatpush1.msra.mxu0 %v761_v29  ;;  %1387 = vmatpush1.msra.mxu1 %v1041_v16 }
 0x278   :  { %v989_v56 = vpop.permute.xlu1 %988  ;;  %1388 = vmatprep.subr.mxu1 %v1017_v61  ;;  %1492 = vmatmul.mubr.msk.f32.vlgmr.msra.gmra.mxu0 %vm1216_vm10, %v2022_v21 }
 0x279   :  { %1389 = vmatpush1.msra.mxu1 %v1016_v20  ;;  %v992_v17 = vsel %vm61_vm8, %v987_v0, %v989_v56 }
 0x27a   :  { %1390 = vmatprep.subr.mxu1 %v992_v17 }
 0x27b   :  { %1391 = vmatpush1.msra.mxu1 %v991_v50 }
 0x27c   :  { %v962_v22 = vpop.permute.xlu1 %961 }
 0x27d   :  { %v966_v23 = vsel %vm37_vm7, %v960_v8, %v962_v22  ;;  %v967_v31 = vsel %vm37_vm7, %v962_v22, %v964_v52 }
 0x27e   :  { %1392 = vmatprep.subr.mxu1 %v967_v31 }
 0x27f   :  { %1393 = vmatpush1.msra.mxu1 %v966_v23 }
 0x280   :  { %1493 = vmatmul.mubr.msk.f32.vlgmr.msra.gmra.mxu1 %vm1216_vm10, %v2022_v21  ;;  %v1440_v21 = vld [vmem:[%s2121_s0 + $0xc] sm:$0xf] }
 0x289   :  { %v1214_v57 = vpop.permute.xlu1 %1213 }
 0x30e   :  { %v1286_v33 = vpop.f32.mrf.mxu1 }
 0x30f   :  { %v1287_v36 = vadd.f32 %v1286_v33, %v1214_v57 }
 0x310   :  { %v1288_v37 = vpop.f32.mrf.mxu1 }
 0x311   :  { %v1289_v32 = vadd.f32 %v1288_v37, %v1214_v57  ;;  %v1433_v39 = vmax.f32 %v1287_v36, 0.0 }
 0x313   :  { %v1434_v1 = vmax.f32 %v1289_v32, 0.0 }
 0x315   :  { %v1443_v42 = vcombine.low %v1433_v39, %v1434_v1 }
 0x317   :  { %v1445_v44 = vadd.f32 %v1443_v42, %v1439_v41 }
 0x319   :  { %1447 = vst [vmem:[%s2127_s6] sm:$0xff] %v1445_v44 }
 0x338   :  { %v1357_v45 = vpop.f32.mrf.mxu0 }
 0x339   :  { %v1358_v34 = vadd.f32 %v1357_v45, %v1214_v57 }
 0x33a   :  { %v1359_v53 = vpop.f32.mrf.mxu0 }
 0x33b   :  { %v1435_v46 = vmax.f32 %v1358_v34, 0.0  ;;  %v1360_v54 = vadd.f32 %v1359_v53, %v1214_v57 }
 0x33d   :  { %v1446_v19 = vadd.f32 %v1440_v21, %v1435_v46  ;;  %v1436_v60 = vmax.f32 %v1360_v54, 0.0 }
 0x33f   :  { %1448 = vst [vmem:[%s2127_s6 + $0x8] sm:$0xf] %v1446_v19 }
 0x340   :  { %v1428_v55 = vpop.f32.mrf.mxu1 }
 0x341   :  { %v1429_v35 = vadd.f32 %v1428_v55, %v1214_v57 }
 0x342   :  { %v1430_v58 = vpop.f32.mrf.mxu1 }
 0x343   :  { %v1437_v62 = vmax.f32 %v1429_v35, 0.0  ;;  %v1431_v38 = vadd.f32 %v1430_v58, %v1214_v57 }
 0x345   :  { %v1453_v24 = vcombine.low %v1436_v60, %v1437_v62  ;;  %v1438_v43 = vmax.f32 %v1431_v38, 0.0 }
 0x347   :  { %v1455_v30 = vadd.f32 %v1494_v63, %v1453_v24  ;;  %v1456_v2 = vadd.f32 %v1495_v40, %v1438_v43 }
 0x349   :  { %1496 = vst [vmem:[%s2127_s6 + $0xc] sm:$0xff] %v1455_v30  ;;  %1497 = vst [vmem:[%s2127_s6 + $0x14] sm:$0xf] %v1456_v2 }

</bundles_post_ra>
